<compile_context>
chip_gen: v7x
topology: tpu7x:2x2x1
jax: 0.10.0
libtpu: 0.0.40
codegen_flags: <defaults>
</compile_context>

<pallas_src>
import functools
import math

import numpy as np
import jax
import jax.numpy as jnp
from jax.experimental import pallas as pl
from jax.experimental.pallas import tpu as pltpu


# ----------------------------------------------------------------------------
# local_mask (same semantics as the torch/numpy version, 1.0 = attend)
# Used only by the pure-JAX reference.
# ----------------------------------------------------------------------------
def local_mask_np(size, width, left_to_right=True):
    m = np.triu(np.ones((size, size)), k=-width - 1) * (1 - np.triu(np.ones((size, size)), k=1))
    if not left_to_right:
        m = np.flip(m)
    return np.ascontiguousarray(m).astype(np.float32)


# ----------------------------------------------------------------------------
# Pallas kernel: one (direction, batch-element) per grid step
# ----------------------------------------------------------------------------
def lbl_layer_kernel(x_ref, wqkv_ref, bqkv_ref, wo_ref, bo_ref,
                     hwn_w_ref, hwn_b_ref, hwg_w_ref, hwg_b_ref, coef_ref,
                     out_ref, ctx_ref, *,
                     n_heads, hidden, width, seq_len, n_highway,
                     compute_dtype, approx_recip):
    H = hidden
    dk = H // n_heads
    Sp = seq_len + 2 * width
    d = pl.program_id(0)                      # 0 = forward, 1 = backward

    x = x_ref[0, 0]                           # (Sp, H), compute dtype

    # ---- fused QKV projection (1/sqrt(dk) folded into the Q columns) -------
    qkv = jnp.dot(x, wqkv_ref[0], preferred_element_type=jnp.float32) + bqkv_ref[0]

    # ---- local-window mask built in-kernel (iota compares on the VPU) ------
    row = jax.lax.broadcasted_iota(jnp.int32, (Sp, Sp), 0)
    col = jax.lax.broadcasted_iota(jnp.int32, (Sp, Sp), 1)
    delta = col - row
    lo = jnp.where(d == 0, -(width + 1), 0)
    hi = jnp.where(d == 0, 0, width + 1)
    keep = (delta >= lo) & (delta <= hi)      # matches local_mask(...) exactly

    # ---- per-head attention: unrolled lane-slice loop, scratch for contexts
    for h in range(n_heads):
        q_h = qkv[:, h * dk:(h + 1) * dk].astype(compute_dtype)
        k_h = qkv[:, H + h * dk:H + (h + 1) * dk].astype(compute_dtype)
        v_h = qkv[:, 2 * H + h * dk:2 * H + (h + 1) * dk].astype(compute_dtype)

        s_h = jax.lax.dot_general(q_h, k_h, (((1,), (1,)), ((), ())),
                                  preferred_element_type=jnp.float32)
        s_h = jnp.where(keep, s_h, -1e9)

        m = jnp.max(s_h, axis=-1, keepdims=True)
        p = jnp.exp(s_h - m)
        denom = jnp.sum(p, axis=-1, keepdims=True)
        p = p * pl.reciprocal(denom, approx=approx_recip)

        ctx_h = jnp.dot(p.astype(compute_dtype), v_h,
                        preferred_element_type=jnp.float32)
        ctx_ref[:, h * dk:(h + 1) * dk] = ctx_h     # lane-offset scratch write

    # ---- single full-width output projection -------------------------------
    ctx = ctx_ref[...].astype(compute_dtype)
    y = jnp.dot(ctx, wo_ref[0], preferred_element_type=jnp.float32) + bo_ref[0]

    # ---- relative-position window sum: shifted adds, SMEM scalar coefs -----
    cur = coef_ref[d, 0] * y[0:seq_len]
    for s in range(1, 2 * width + 1):
        cur = cur + coef_ref[d, s] * y[s:s + seq_len]

    # ---- Highway block (lane-aligned split nonlinear / gate weights) -------
    for l in range(n_highway):
        cur_c = cur.astype(compute_dtype)
        nonlin = jax.nn.relu(
            jnp.dot(cur_c, hwn_w_ref[0, l], preferred_element_type=jnp.float32)
            + hwn_b_ref[0, l])
        gate = jax.nn.sigmoid(
            jnp.dot(cur_c, hwg_w_ref[0, l], preferred_element_type=jnp.float32)
            + hwg_b_ref[0, l])
        cur = gate * cur + (1.0 - gate) * nonlin

    out_ref[0, 0] = cur.astype(out_ref.dtype)


def lbl_layer_pallas(x_dir, packed, *, n_heads, n_highway, width, seq_len,
                     compute_dtype, approx_recip):
    """x_dir: (2, B, Sp, H) stacked fwd/bwd padded inputs; returns (2, B, seq, H)."""
    _, B, Sp, H = x_dir.shape
    nhw = n_highway

    kernel = functools.partial(
        lbl_layer_kernel, n_heads=n_heads, hidden=H, width=width,
        seq_len=seq_len, n_highway=n_highway,
        compute_dtype=compute_dtype, approx_recip=approx_recip)

    def wspec(*shape):
        # Per-direction weight block; constant along the batch grid axis so the
        # block stays VMEM-resident (no re-DMA per batch element).
        return pl.BlockSpec((1,) + shape, lambda d, b, _s=shape: (d,) + (0,) * len(_s))

    return pl.pallas_call(
        kernel,
        out_shape=jax.ShapeDtypeStruct((2, B, seq_len, H), jnp.float32),
        grid=(2, B),
        in_specs=[
            pl.BlockSpec((1, 1, Sp, H), lambda d, b: (d, b, 0, 0)),   # x
            wspec(H, 3 * H),          # packed QKV weight (scale folded into Q)
            wspec(1, 3 * H),          # packed QKV bias
            wspec(H, H),              # output projection weight
            wspec(1, H),              # output projection bias
            wspec(nhw, H, H),         # highway nonlinear weights
            wspec(nhw, 1, H),         # highway nonlinear biases
            wspec(nhw, H, H),         # highway gate weights
            wspec(nhw, 1, H),         # highway gate biases
            pl.BlockSpec(memory_space=pltpu.MemorySpace.SMEM),        # coef (2, 2w+1)
        ],
        out_specs=pl.BlockSpec((1, 1, seq_len, H), lambda d, b: (d, b, 0, 0)),
        scratch_shapes=[pltpu.VMEM((Sp, H), jnp.float32)],            # head contexts
        compiler_params=pltpu.CompilerParams(
            dimension_semantics=("parallel", "parallel"),
            vmem_limit_bytes=32 * 1024 * 1024),
    )(x_dir, packed["wqkv"], packed["bqkv"], packed["wo"], packed["bo"],
      packed["hwn_w"], packed["hwn_b"], packed["hwg_w"], packed["hwg_b"],
      packed["coef"])


# ----------------------------------------------------------------------------
# Parameter packing (pure JAX glue, done once per layer)
# ----------------------------------------------------------------------------
def _pack_direction(p, *, rel_offset, width, n_heads, compute_dtype):
    H = p["wq"].shape[0]
    dk = H // n_heads
    scale = 1.0 / math.sqrt(dk)

    wqkv = jnp.concatenate([p["wq"] * scale, p["wk"], p["wv"]], axis=1).astype(compute_dtype)
    bqkv = jnp.concatenate([p["bq"] * scale, p["bk"], p["bv"]], axis=1)   # f32

    # Window-sum coefficients over shifts s=0..2*width:
    #   cur[t] = y[t+width] + sum_j relw[j] * y[t + rel_offset + j]
    coef = jnp.zeros((2 * width + 1,), jnp.float32)
    coef = coef.at[rel_offset:rel_offset + width + 1].set(p["relw"][0])
    coef = coef.at[width].add(1.0)

    return dict(
        wqkv=wqkv, bqkv=bqkv,
        wo=p["wo"].astype(compute_dtype), bo=p["bo"],
        hwn_w=p["hw_w"][:, :, :H].astype(compute_dtype),
        hwg_w=p["hw_w"][:, :, H:].astype(compute_dtype),
        hwn_b=p["hw_b"][:, :, :H], hwg_b=p["hw_b"][:, :, H:],
        coef=coef)


def _pack_layer(layer, *, width, n_heads, compute_dtype):
    fwd = _pack_direction(layer["fwd"], rel_offset=0, width=width,
                          n_heads=n_heads, compute_dtype=compute_dtype)
    bwd = _pack_direction(layer["bwd"], rel_offset=width, width=width,
                          n_heads=n_heads, compute_dtype=compute_dtype)
    return {k: jnp.stack([fwd[k], bwd[k]], axis=0) for k in fwd}


# ----------------------------------------------------------------------------
# Full SelfAttentiveLBLBiLM forward (Pallas path)
# ----------------------------------------------------------------------------
def self_attentive_lbl_bilm_forward_pallas(inputs, params, *, width, n_heads,
                                           n_highway,
                                           compute_dtype=jnp.bfloat16,
                                           approx_recip=True):
    B, seq_len, H = inputs.shape
    packed_layers = [_pack_layer(layer, width=width, n_heads=n_heads,
                                 compute_dtype=compute_dtype) for layer in params]

    # TODO(synk): PositionalEncoding omitted (use_position=False); dropout is
    # eval-mode identity.
    forward_inputs = inputs
    backward_inputs = inputs
    all_layers = []
    for layer, packed in zip(params, packed_layers):
        fpad = jnp.broadcast_to(layer["fwd_pad"], (B, width, H))
        bpad = jnp.broadcast_to(layer["bwd_pad"], (B, width, H))
        f_in = jnp.concatenate([fpad, forward_inputs, bpad], axis=1)      # (B, Sp, H)
        b_in = jnp.concatenate([fpad, backward_inputs, bpad], axis=1)
        x_dir = jnp.stack([f_in, b_in], axis=0).astype(compute_dtype)     # (2, B, Sp, H)

        out = lbl_layer_pallas(x_dir, packed, n_heads=n_heads,
                               n_highway=n_highway, width=width,
                               seq_len=seq_len, compute_dtype=compute_dtype,
                               approx_recip=approx_recip)
        forward_inputs = out[0]
        backward_inputs = out[1]
        all_layers.append(jnp.concatenate([forward_inputs, backward_inputs], axis=-1))
    return jnp.stack(all_layers, axis=0)


# ----------------------------------------------------------------------------
# Pure-JAX reference (used only to verify the kernel)
# ----------------------------------------------------------------------------
def lbl_layer_ref(x_padded, mask, p, *, rel_offset, seq_len, width, n_heads, n_highway):
    B, Sp, H = x_padded.shape
    dk = H // n_heads
    q = (x_padded @ p["wq"] + p["bq"]).reshape(B, Sp, n_heads, dk).transpose(0, 2, 1, 3)
    k = (x_padded @ p["wk"] + p["bk"]).reshape(B, Sp, n_heads, dk).transpose(0, 2, 1, 3)
    v = (x_padded @ p["wv"] + p["bv"]).reshape(B, Sp, n_heads, dk).transpose(0, 2, 1, 3)
    scores = jnp.einsum("bhqd,bhkd->bhqk", q, k) / math.sqrt(dk)
    scores = jnp.where(mask[None, None] == 0.0, -1e9, scores)
    p_attn = jax.nn.softmax(scores, axis=-1)
    ctx = jnp.einsum("bhqk,bhkd->bhqd", p_attn, v).transpose(0, 2, 1, 3).reshape(B, Sp, H)
    y = ctx @ p["wo"] + p["bo"]
    cur = y[:, width:width + seq_len]
    for j in range(width + 1):
        cur = cur + y[:, rel_offset + j: rel_offset + j + seq_len] * p["relw"][0, j]
    for l in range(n_highway):
        proj = cur @ p["hw_w"][l] + p["hw_b"][l]
        nonlinear = jax.nn.relu(proj[..., :H])
        gate = jax.nn.sigmoid(proj[..., H:])
        cur = gate * cur + (1.0 - gate) * nonlinear
    return cur


def self_attentive_lbl_bilm_forward_ref(inputs, params, *, width, n_heads, n_highway):
    B, seq_len, H = inputs.shape
    Sp = seq_len + 2 * width
    fwd_mask = jnp.asarray(local_mask_np(Sp, width, True))
    bwd_mask = jnp.asarray(local_mask_np(Sp, width, False))
    forward_inputs = inputs
    backward_inputs = inputs
    all_layers = []
    for layer in params:
        fpad = jnp.broadcast_to(layer["fwd_pad"], (B, width, H))
        bpad = jnp.broadcast_to(layer["bwd_pad"], (B, width, H))
        f_in = jnp.concatenate([fpad, forward_inputs, bpad], axis=1)
        b_in = jnp.concatenate([fpad, backward_inputs, bpad], axis=1)
        forward_inputs = lbl_layer_ref(f_in, fwd_mask, layer["fwd"], rel_offset=0,
                                       seq_len=seq_len, width=width,
                                       n_heads=n_heads, n_highway=n_highway)
        backward_inputs = lbl_layer_ref(b_in, bwd_mask, layer["bwd"], rel_offset=width,
                                        seq_len=seq_len, width=width,
                                        n_heads=n_heads, n_highway=n_highway)
        all_layers.append(jnp.concatenate([forward_inputs, backward_inputs], axis=-1))
    return jnp.stack(all_layers, axis=0)


# ----------------------------------------------------------------------------
# Deterministic parameter initialization (synthetic; shapes from __init__)
# ----------------------------------------------------------------------------
def init_params(key, *, n_layers, hidden, width, n_highway):
    layers = []
    for _ in range(n_layers):
        key, lkey = jax.random.split(key)
        kit = iter(jax.random.split(lkey, 64))

        def dense(din, dout):
            w = jax.random.normal(next(kit), (din, dout), jnp.float32) / np.sqrt(din)
            b = jax.random.normal(next(kit), (1, dout), jnp.float32) * 0.01
            return w, b

        def direction():
            wq, bq = dense(hidden, hidden)
            wk, bk = dense(hidden, hidden)
            wv, bv = dense(hidden, hidden)
            wo, bo = dense(hidden, hidden)
            relw = jax.random.normal(next(kit), (1, width + 1), jnp.float32)
            hw_ws, hw_bs = [], []
            for _ in range(n_highway):
                w, b = dense(hidden, 2 * hidden)
                hw_ws.append(w)
                hw_bs.append(b)
            return dict(wq=wq, bq=bq, wk=wk, bk=bk, wv=wv, bv=bv, wo=wo, bo=bo,
                        relw=relw, hw_w=jnp.stack(hw_ws, 0), hw_b=jnp.stack(hw_bs, 0))

        fwd = direction()
        bwd = direction()
        fwd_pad = jax.random.normal(next(kit), (width, hidden), jnp.float32) / np.sqrt(hidden)
        bwd_pad = jax.random.normal(next(kit), (width, hidden), jnp.float32) / np.sqrt(hidden)
        layers.append(dict(fwd=fwd, bwd=bwd, fwd_pad=fwd_pad, bwd_pad=bwd_pad))
    return layers


if __name__ == "__main__":
    # config: n_layers=2, n_highway=2, n_heads=4, projection_dim=32, width=3
    B, SEQ, H = 2, 8, 32
    N_LAYERS, N_HEADS, WIDTH, N_HIGHWAY = 2, 4, 3, 2

    key = jax.random.PRNGKey(0)
    key, pkey, xkey = jax.random.split(key, 3)
    params = init_params(pkey, n_layers=N_LAYERS, hidden=H, width=WIDTH,
                         n_highway=N_HIGHWAY)
    inputs = jax.random.normal(xkey, (B, SEQ, H), jnp.float32)

    ref = self_attentive_lbl_bilm_forward_ref(
        inputs, params, width=WIDTH, n_heads=N_HEADS, n_highway=N_HIGHWAY)

    # Exact path (f32 matmuls, exact reciprocal): tight semantic check.
    f32_fn = jax.jit(functools.partial(
        self_attentive_lbl_bilm_forward_pallas,
        width=WIDTH, n_heads=N_HEADS, n_highway=N_HIGHWAY,
        compute_dtype=jnp.float32, approx_recip=False))
    out_f32 = jax.block_until_ready(f32_fn(inputs, params))
    assert out_f32.shape == (N_LAYERS, B, SEQ, 2 * H), out_f32.shape
    np.testing.assert_allclose(np.asarray(out_f32), np.asarray(ref), rtol=1e-4, atol=1e-4)

    # Perf path (bf16 matmul operands + approx EUP reciprocal): loose check.
    bf16_fn = jax.jit(functools.partial(
        self_attentive_lbl_bilm_forward_pallas,
        width=WIDTH, n_heads=N_HEADS, n_highway=N_HIGHWAY,
        compute_dtype=jnp.bfloat16, approx_recip=True))
    out_bf16 = jax.block_until_ready(bf16_fn(inputs, params))
    assert out_bf16.shape == (N_LAYERS, B, SEQ, 2 * H), out_bf16.shape
    np.testing.assert_allclose(np.asarray(out_bf16), np.asarray(ref), rtol=5e-2, atol=5e-2)

    print("KERNEL_OK")
</pallas_src>

<mosaic_0001>
module attributes {stable_mosaic.version = 11 : i64} {
  func.func @lbl_layer_kernel(%arg0: i32, %arg1: i32, %arg2: memref<1x1x14x32xf32, #tpu.memory_space<vmem>>, %arg3: memref<1x32x96xf32, #tpu.memory_space<vmem>>, %arg4: memref<1x1x96xf32, #tpu.memory_space<vmem>>, %arg5: memref<1x32x32xf32, #tpu.memory_space<vmem>>, %arg6: memref<1x1x32xf32, #tpu.memory_space<vmem>>, %arg7: memref<1x2x32x32xf32, #tpu.memory_space<vmem>>, %arg8: memref<1x2x1x32xf32, #tpu.memory_space<vmem>>, %arg9: memref<1x2x32x32xf32, #tpu.memory_space<vmem>>, %arg10: memref<1x2x1x32xf32, #tpu.memory_space<vmem>>, %arg11: memref<2x7xf32, #tpu.memory_space<smem>>, %arg12: memref<1x1x8x32xf32, #tpu.memory_space<vmem>>, %arg13: memref<14x32xf32, #tpu.memory_space<vmem>>) attributes {dimension_semantics = [#tpu.dimension_semantics<parallel>, #tpu.dimension_semantics<parallel>], iteration_bounds = array<i64: 2, 2>, scalar_prefetch = 0 : i64, scratch_operands = 1 : i64, tpu.core_type = #tpu.core_type<tc>, window_params = [{transform_indices = @transform_0, window_bounds = array<i64: 1, 1, 14, 32>}, {transform_indices = @transform_1, window_bounds = array<i64: 1, 32, 96>}, {transform_indices = @transform_2, window_bounds = array<i64: 1, 1, 96>}, {transform_indices = @transform_3, window_bounds = array<i64: 1, 32, 32>}, {transform_indices = @transform_4, window_bounds = array<i64: 1, 1, 32>}, {transform_indices = @transform_5, window_bounds = array<i64: 1, 2, 32, 32>}, {transform_indices = @transform_6, window_bounds = array<i64: 1, 2, 1, 32>}, {transform_indices = @transform_7, window_bounds = array<i64: 1, 2, 32, 32>}, {transform_indices = @transform_8, window_bounds = array<i64: 1, 2, 1, 32>}, {transform_indices = @transform_9, window_bounds = array<i64: 2, 7>}, {transform_indices = @transform_10, window_bounds = array<i64: 1, 1, 8, 32>}]} {
    %c0 = arith.constant 0 : index
    %c0_0 = arith.constant 0 : index
    %c0_1 = arith.constant 0 : index
    %c0_2 = arith.constant 0 : index
    %0 = vector.load %arg2[%c0, %c0_0, %c0_1, %c0_2] : memref<1x1x14x32xf32, #tpu.memory_space<vmem>>, vector<1x1x14x32xf32>
    %1 = vector.shape_cast %0 : vector<1x1x14x32xf32> to vector<14x32xf32>
    %c0_3 = arith.constant 0 : index
    %c0_4 = arith.constant 0 : index
    %c0_5 = arith.constant 0 : index
    %2 = vector.load %arg3[%c0_3, %c0_4, %c0_5] : memref<1x32x96xf32, #tpu.memory_space<vmem>>, vector<1x32x96xf32>
    %3 = vector.shape_cast %2 : vector<1x32x96xf32> to vector<32x96xf32>
    %cst = arith.constant dense<0.000000e+00> : vector<14x96xf32>
    %4 = tpu.matmul %1, %3, %cst {dimension_numbers = #tpu.dot_dimension_numbers<[1], [0], [0], [1], [0, 0, 1, 1], [], []>} : vector<14x32xf32>, vector<32x96xf32>, vector<14x96xf32> -> vector<14x96xf32>
    %c0_6 = arith.constant 0 : index
    %c0_7 = arith.constant 0 : index
    %c0_8 = arith.constant 0 : index
    %5 = vector.load %arg4[%c0_6, %c0_7, %c0_8] : memref<1x1x96xf32, #tpu.memory_space<vmem>>, vector<1x1x96xf32>
    %6 = vector.shape_cast %5 : vector<1x1x96xf32> to vector<1x96xf32>
    %7 = vector.broadcast %6 : vector<1x96xf32> to vector<14x96xf32>
    %8 = arith.addf %4, %7 : vector<14x96xf32>
    %9 = tpu.iota {dimensions = array<i32: 0>} : vector<14x14xi32>
    %10 = tpu.iota {dimensions = array<i32: 1>} : vector<14x14xi32>
    %11 = arith.subi %10, %9 : vector<14x14xi32>
    %c0_i32 = arith.constant 0 : i32
    %12 = arith.cmpi eq, %arg0, %c0_i32 : i32
    %c-4_i32 = arith.constant -4 : i32
    %c0_i32_9 = arith.constant 0 : i32
    %13 = arith.select %12, %c-4_i32, %c0_i32_9 : i32
    %c0_i32_10 = arith.constant 0 : i32
    %14 = arith.cmpi eq, %arg0, %c0_i32_10 : i32
    %c0_i32_11 = arith.constant 0 : i32
    %c4_i32 = arith.constant 4 : i32
    %15 = arith.select %14, %c0_i32_11, %c4_i32 : i32
    %16 = vector.broadcast %13 : i32 to vector<14x14xi32>
    %17 = arith.cmpi sge, %11, %16 : vector<14x14xi32>
    %18 = vector.broadcast %15 : i32 to vector<14x14xi32>
    %19 = arith.cmpi sle, %11, %18 : vector<14x14xi32>
    %20 = arith.andi %17, %19 : vector<14x14xi1>
    %21 = vector.extract_strided_slice %8 {offsets = [0, 0], sizes = [14, 8], strides = [1, 1]} : vector<14x96xf32> to vector<14x8xf32>
    %22 = vector.extract_strided_slice %8 {offsets = [0, 32], sizes = [14, 8], strides = [1, 1]} : vector<14x96xf32> to vector<14x8xf32>
    %23 = vector.extract_strided_slice %8 {offsets = [0, 64], sizes = [14, 8], strides = [1, 1]} : vector<14x96xf32> to vector<14x8xf32>
    %cst_12 = arith.constant dense<0.000000e+00> : vector<14x14xf32>
    %24 = tpu.matmul %21, %22, %cst_12 {dimension_numbers = #tpu.dot_dimension_numbers<[1], [1], [0], [0], [0, 0, 1, 0], [], []>} : vector<14x8xf32>, vector<14x8xf32>, vector<14x14xf32> -> vector<14x14xf32>
    %cst_13 = arith.constant -1.000000e+09 : f32
    %25 = vector.broadcast %cst_13 : f32 to vector<14x14xf32>
    %26 = arith.select %20, %24, %25 : vector<14x14xi1>, vector<14x14xf32>
    %cst_14 = arith.constant dense<0xFF800000> : vector<14xf32>
    %27 = vector.multi_reduction <maximumf>, %26, %cst_14 [1] : vector<14x14xf32> to vector<14xf32>
    %28 = vector.shape_cast %27 : vector<14xf32> to vector<14x1xf32>
    %29 = vector.broadcast %28 : vector<14x1xf32> to vector<14x14xf32>
    %30 = arith.subf %26, %29 : vector<14x14xf32>
    %31 = math.exp %30 : vector<14x14xf32>
    %cst_15 = arith.constant dense<0.000000e+00> : vector<14xf32>
    %32 = vector.multi_reduction <add>, %31, %cst_15 [1] : vector<14x14xf32> to vector<14xf32>
    %33 = vector.shape_cast %32 : vector<14xf32> to vector<14x1xf32>
    %34 = tpu.reciprocal %33 : vector<14x1xf32> -> vector<14x1xf32>
    %35 = vector.broadcast %34 : vector<14x1xf32> to vector<14x14xf32>
    %36 = arith.mulf %31, %35 : vector<14x14xf32>
    %cst_16 = arith.constant dense<0.000000e+00> : vector<14x8xf32>
    %37 = tpu.matmul %36, %23, %cst_16 {dimension_numbers = #tpu.dot_dimension_numbers<[1], [0], [0], [1], [0, 0, 1, 1], [], []>} : vector<14x14xf32>, vector<14x8xf32>, vector<14x8xf32> -> vector<14x8xf32>
    %c0_17 = arith.constant 0 : index
    %c0_18 = arith.constant 0 : index
    %38 = vector.load %arg13[%c0_17, %c0_18] : memref<14x32xf32, #tpu.memory_space<vmem>>, vector<14x8xf32>
    tpu.vector_store %arg13[%c0_17, %c0_18], %37 {strides = array<i32>} : memref<14x32xf32, #tpu.memory_space<vmem>>, vector<14x8xf32>,
    %39 = vector.extract_strided_slice %8 {offsets = [0, 8], sizes = [14, 8], strides = [1, 1]} : vector<14x96xf32> to vector<14x8xf32>
    %40 = vector.extract_strided_slice %8 {offsets = [0, 40], sizes = [14, 8], strides = [1, 1]} : vector<14x96xf32> to vector<14x8xf32>
    %41 = vector.extract_strided_slice %8 {offsets = [0, 72], sizes = [14, 8], strides = [1, 1]} : vector<14x96xf32> to vector<14x8xf32>
    %cst_19 = arith.constant dense<0.000000e+00> : vector<14x14xf32>
    %42 = tpu.matmul %39, %40, %cst_19 {dimension_numbers = #tpu.dot_dimension_numbers<[1], [1], [0], [0], [0, 0, 1, 0], [], []>} : vector<14x8xf32>, vector<14x8xf32>, vector<14x14xf32> -> vector<14x14xf32>
    %cst_20 = arith.constant -1.000000e+09 : f32
    %43 = vector.broadcast %cst_20 : f32 to vector<14x14xf32>
    %44 = arith.select %20, %42, %43 : vector<14x14xi1>, vector<14x14xf32>
    %cst_21 = arith.constant dense<0xFF800000> : vector<14xf32>
    %45 = vector.multi_reduction <maximumf>, %44, %cst_21 [1] : vector<14x14xf32> to vector<14xf32>
    %46 = vector.shape_cast %45 : vector<14xf32> to vector<14x1xf32>
    %47 = vector.broadcast %46 : vector<14x1xf32> to vector<14x14xf32>
    %48 = arith.subf %44, %47 : vector<14x14xf32>
    %49 = math.exp %48 : vector<14x14xf32>
    %cst_22 = arith.constant dense<0.000000e+00> : vector<14xf32>
    %50 = vector.multi_reduction <add>, %49, %cst_22 [1] : vector<14x14xf32> to vector<14xf32>
    %51 = vector.shape_cast %50 : vector<14xf32> to vector<14x1xf32>
    %52 = tpu.reciprocal %51 : vector<14x1xf32> -> vector<14x1xf32>
    %53 = vector.broadcast %52 : vector<14x1xf32> to vector<14x14xf32>
    %54 = arith.mulf %49, %53 : vector<14x14xf32>
    %cst_23 = arith.constant dense<0.000000e+00> : vector<14x8xf32>
    %55 = tpu.matmul %54, %41, %cst_23 {dimension_numbers = #tpu.dot_dimension_numbers<[1], [0], [0], [1], [0, 0, 1, 1], [], []>} : vector<14x14xf32>, vector<14x8xf32>, vector<14x8xf32> -> vector<14x8xf32>
    %c0_24 = arith.constant 0 : index
    %c8 = arith.constant 8 : index
    %56 = vector.load %arg13[%c0_24, %c8] : memref<14x32xf32, #tpu.memory_space<vmem>>, vector<14x8xf32>
    tpu.vector_store %arg13[%c0_24, %c8], %55 {strides = array<i32>} : memref<14x32xf32, #tpu.memory_space<vmem>>, vector<14x8xf32>,
    %57 = vector.extract_strided_slice %8 {offsets = [0, 16], sizes = [14, 8], strides = [1, 1]} : vector<14x96xf32> to vector<14x8xf32>
    %58 = vector.extract_strided_slice %8 {offsets = [0, 48], sizes = [14, 8], strides = [1, 1]} : vector<14x96xf32> to vector<14x8xf32>
    %59 = vector.extract_strided_slice %8 {offsets = [0, 80], sizes = [14, 8], strides = [1, 1]} : vector<14x96xf32> to vector<14x8xf32>
    %cst_25 = arith.constant dense<0.000000e+00> : vector<14x14xf32>
    %60 = tpu.matmul %57, %58, %cst_25 {dimension_numbers = #tpu.dot_dimension_numbers<[1], [1], [0], [0], [0, 0, 1, 0], [], []>} : vector<14x8xf32>, vector<14x8xf32>, vector<14x14xf32> -> vector<14x14xf32>
    %cst_26 = arith.constant -1.000000e+09 : f32
    %61 = vector.broadcast %cst_26 : f32 to vector<14x14xf32>
    %62 = arith.select %20, %60, %61 : vector<14x14xi1>, vector<14x14xf32>
    %cst_27 = arith.constant dense<0xFF800000> : vector<14xf32>
    %63 = vector.multi_reduction <maximumf>, %62, %cst_27 [1] : vector<14x14xf32> to vector<14xf32>
    %64 = vector.shape_cast %63 : vector<14xf32> to vector<14x1xf32>
    %65 = vector.broadcast %64 : vector<14x1xf32> to vector<14x14xf32>
    %66 = arith.subf %62, %65 : vector<14x14xf32>
    %67 = math.exp %66 : vector<14x14xf32>
    %cst_28 = arith.constant dense<0.000000e+00> : vector<14xf32>
    %68 = vector.multi_reduction <add>, %67, %cst_28 [1] : vector<14x14xf32> to vector<14xf32>
    %69 = vector.shape_cast %68 : vector<14xf32> to vector<14x1xf32>
    %70 = tpu.reciprocal %69 : vector<14x1xf32> -> vector<14x1xf32>
    %71 = vector.broadcast %70 : vector<14x1xf32> to vector<14x14xf32>
    %72 = arith.mulf %67, %71 : vector<14x14xf32>
    %cst_29 = arith.constant dense<0.000000e+00> : vector<14x8xf32>
    %73 = tpu.matmul %72, %59, %cst_29 {dimension_numbers = #tpu.dot_dimension_numbers<[1], [0], [0], [1], [0, 0, 1, 1], [], []>} : vector<14x14xf32>, vector<14x8xf32>, vector<14x8xf32> -> vector<14x8xf32>
    %c0_30 = arith.constant 0 : index
    %c16 = arith.constant 16 : index
    %74 = vector.load %arg13[%c0_30, %c16] : memref<14x32xf32, #tpu.memory_space<vmem>>, vector<14x8xf32>
    tpu.vector_store %arg13[%c0_30, %c16], %73 {strides = array<i32>} : memref<14x32xf32, #tpu.memory_space<vmem>>, vector<14x8xf32>,
    %75 = vector.extract_strided_slice %8 {offsets = [0, 24], sizes = [14, 8], strides = [1, 1]} : vector<14x96xf32> to vector<14x8xf32>
    %76 = vector.extract_strided_slice %8 {offsets = [0, 56], sizes = [14, 8], strides = [1, 1]} : vector<14x96xf32> to vector<14x8xf32>
    %77 = vector.extract_strided_slice %8 {offsets = [0, 88], sizes = [14, 8], strides = [1, 1]} : vector<14x96xf32> to vector<14x8xf32>
    %cst_31 = arith.constant dense<0.000000e+00> : vector<14x14xf32>
    %78 = tpu.matmul %75, %76, %cst_31 {dimension_numbers = #tpu.dot_dimension_numbers<[1], [1], [0], [0], [0, 0, 1, 0], [], []>} : vector<14x8xf32>, vector<14x8xf32>, vector<14x14xf32> -> vector<14x14xf32>
    %cst_32 = arith.constant -1.000000e+09 : f32
    %79 = vector.broadcast %cst_32 : f32 to vector<14x14xf32>
    %80 = arith.select %20, %78, %79 : vector<14x14xi1>, vector<14x14xf32>
    %cst_33 = arith.constant dense<0xFF800000> : vector<14xf32>
    %81 = vector.multi_reduction <maximumf>, %80, %cst_33 [1] : vector<14x14xf32> to vector<14xf32>
    %82 = vector.shape_cast %81 : vector<14xf32> to vector<14x1xf32>
    %83 = vector.broadcast %82 : vector<14x1xf32> to vector<14x14xf32>
    %84 = arith.subf %80, %83 : vector<14x14xf32>
    %85 = math.exp %84 : vector<14x14xf32>
    %cst_34 = arith.constant dense<0.000000e+00> : vector<14xf32>
    %86 = vector.multi_reduction <add>, %85, %cst_34 [1] : vector<14x14xf32> to vector<14xf32>
    %87 = vector.shape_cast %86 : vector<14xf32> to vector<14x1xf32>
    %88 = tpu.reciprocal %87 : vector<14x1xf32> -> vector<14x1xf32>
    %89 = vector.broadcast %88 : vector<14x1xf32> to vector<14x14xf32>
    %90 = arith.mulf %85, %89 : vector<14x14xf32>
    %cst_35 = arith.constant dense<0.000000e+00> : vector<14x8xf32>
    %91 = tpu.matmul %90, %77, %cst_35 {dimension_numbers = #tpu.dot_dimension_numbers<[1], [0], [0], [1], [0, 0, 1, 1], [], []>} : vector<14x14xf32>, vector<14x8xf32>, vector<14x8xf32> -> vector<14x8xf32>
    %c0_36 = arith.constant 0 : index
    %c24 = arith.constant 24 : index
    %92 = vector.load %arg13[%c0_36, %c24] : memref<14x32xf32, #tpu.memory_space<vmem>>, vector<14x8xf32>
    tpu.vector_store %arg13[%c0_36, %c24], %91 {strides = array<i32>} : memref<14x32xf32, #tpu.memory_space<vmem>>, vector<14x8xf32>,
    %c0_37 = arith.constant 0 : index
    %c0_38 = arith.constant 0 : index
    %93 = vector.load %arg13[%c0_37, %c0_38] : memref<14x32xf32, #tpu.memory_space<vmem>>, vector<14x32xf32>
    %c0_39 = arith.constant 0 : index
    %c0_40 = arith.constant 0 : index
    %c0_41 = arith.constant 0 : index
    %94 = vector.load %arg5[%c0_39, %c0_40, %c0_41] : memref<1x32x32xf32, #tpu.memory_space<vmem>>, vector<1x32x32xf32>
    %95 = vector.shape_cast %94 : vector<1x32x32xf32> to vector<32x32xf32>
    %cst_42 = arith.constant dense<0.000000e+00> : vector<14x32xf32>
    %96 = tpu.matmul %93, %95, %cst_42 {dimension_numbers = #tpu.dot_dimension_numbers<[1], [0], [0], [1], [0, 0, 1, 1], [], []>} : vector<14x32xf32>, vector<32x32xf32>, vector<14x32xf32> -> vector<14x32xf32>
    %c0_43 = arith.constant 0 : index
    %c0_44 = arith.constant 0 : index
    %c0_45 = arith.constant 0 : index
    %97 = vector.load %arg6[%c0_43, %c0_44, %c0_45] : memref<1x1x32xf32, #tpu.memory_space<vmem>>, vector<1x1x32xf32>
    %98 = vector.shape_cast %97 : vector<1x1x32xf32> to vector<1x32xf32>
    %99 = vector.broadcast %98 : vector<1x32xf32> to vector<14x32xf32>
    %100 = arith.addf %96, %99 : vector<14x32xf32>
    %101 = arith.index_cast %arg0 : i32 to index
    %c0_46 = arith.constant 0 : index
    %102 = memref.load %arg11[%101, %c0_46] : memref<2x7xf32, #tpu.memory_space<smem>>
    %103 = vector.extract_strided_slice %100 {offsets = [0, 0], sizes = [8, 32], strides = [1, 1]} : vector<14x32xf32> to vector<8x32xf32>
    %104 = vector.broadcast %102 : f32 to vector<8x32xf32>
    %105 = arith.mulf %104, %103 : vector<8x32xf32>
    %106 = arith.index_cast %arg0 : i32 to index
    %c1 = arith.constant 1 : index
    %107 = memref.load %arg11[%106, %c1] : memref<2x7xf32, #tpu.memory_space<smem>>
    %108 = vector.extract_strided_slice %100 {offsets = [1, 0], sizes = [8, 32], strides = [1, 1]} : vector<14x32xf32> to vector<8x32xf32>
    %109 = vector.broadcast %107 : f32 to vector<8x32xf32>
    %110 = arith.mulf %109, %108 : vector<8x32xf32>
    %111 = arith.addf %105, %110 : vector<8x32xf32>
    %112 = arith.index_cast %arg0 : i32 to index
    %c2 = arith.constant 2 : index
    %113 = memref.load %arg11[%112, %c2] : memref<2x7xf32, #tpu.memory_space<smem>>
    %114 = vector.extract_strided_slice %100 {offsets = [2, 0], sizes = [8, 32], strides = [1, 1]} : vector<14x32xf32> to vector<8x32xf32>
    %115 = vector.broadcast %113 : f32 to vector<8x32xf32>
    %116 = arith.mulf %115, %114 : vector<8x32xf32>
    %117 = arith.addf %111, %116 : vector<8x32xf32>
    %118 = arith.index_cast %arg0 : i32 to index
    %c3 = arith.constant 3 : index
    %119 = memref.load %arg11[%118, %c3] : memref<2x7xf32, #tpu.memory_space<smem>>
    %120 = vector.extract_strided_slice %100 {offsets = [3, 0], sizes = [8, 32], strides = [1, 1]} : vector<14x32xf32> to vector<8x32xf32>
    %121 = vector.broadcast %119 : f32 to vector<8x32xf32>
    %122 = arith.mulf %121, %120 : vector<8x32xf32>
    %123 = arith.addf %117, %122 : vector<8x32xf32>
    %124 = arith.index_cast %arg0 : i32 to index
    %c4 = arith.constant 4 : index
    %125 = memref.load %arg11[%124, %c4] : memref<2x7xf32, #tpu.memory_space<smem>>
    %126 = vector.extract_strided_slice %100 {offsets = [4, 0], sizes = [8, 32], strides = [1, 1]} : vector<14x32xf32> to vector<8x32xf32>
    %127 = vector.broadcast %125 : f32 to vector<8x32xf32>
    %128 = arith.mulf %127, %126 : vector<8x32xf32>
    %129 = arith.addf %123, %128 : vector<8x32xf32>
    %130 = arith.index_cast %arg0 : i32 to index
    %c5 = arith.constant 5 : index
    %131 = memref.load %arg11[%130, %c5] : memref<2x7xf32, #tpu.memory_space<smem>>
    %132 = vector.extract_strided_slice %100 {offsets = [5, 0], sizes = [8, 32], strides = [1, 1]} : vector<14x32xf32> to vector<8x32xf32>
    %133 = vector.broadcast %131 : f32 to vector<8x32xf32>
    %134 = arith.mulf %133, %132 : vector<8x32xf32>
    %135 = arith.addf %129, %134 : vector<8x32xf32>
    %136 = arith.index_cast %arg0 : i32 to index
    %c6 = arith.constant 6 : index
    %137 = memref.load %arg11[%136, %c6] : memref<2x7xf32, #tpu.memory_space<smem>>
    %138 = vector.extract_strided_slice %100 {offsets = [6, 0], sizes = [8, 32], strides = [1, 1]} : vector<14x32xf32> to vector<8x32xf32>
    %139 = vector.broadcast %137 : f32 to vector<8x32xf32>
    %140 = arith.mulf %139, %138 : vector<8x32xf32>
    %141 = arith.addf %135, %140 : vector<8x32xf32>
    %c0_47 = arith.constant 0 : index
    %c0_48 = arith.constant 0 : index
    %c0_49 = arith.constant 0 : index
    %c0_50 = arith.constant 0 : index
    %142 = vector.load %arg7[%c0_47, %c0_48, %c0_49, %c0_50] : memref<1x2x32x32xf32, #tpu.memory_space<vmem>>, vector<1x1x32x32xf32>
    %143 = vector.shape_cast %142 : vector<1x1x32x32xf32> to vector<32x32xf32>
    %cst_51 = arith.constant dense<0.000000e+00> : vector<8x32xf32>
    %144 = tpu.matmul %141, %143, %cst_51 {dimension_numbers = #tpu.dot_dimension_numbers<[1], [0], [0], [1], [0, 0, 1, 1], [], []>} : vector<8x32xf32>, vector<32x32xf32>, vector<8x32xf32> -> vector<8x32xf32>
    %c0_52 = arith.constant 0 : index
    %c0_53 = arith.constant 0 : index
    %c0_54 = arith.constant 0 : index
    %c0_55 = arith.constant 0 : index
    %145 = vector.load %arg8[%c0_52, %c0_53, %c0_54, %c0_55] : memref<1x2x1x32xf32, #tpu.memory_space<vmem>>, vector<1x1x1x32xf32>
    %146 = vector.shape_cast %145 : vector<1x1x1x32xf32> to vector<1x32xf32>
    %147 = vector.broadcast %146 : vector<1x32xf32> to vector<8x32xf32>
    %148 = arith.addf %144, %147 : vector<8x32xf32>
    %cst_56 = arith.constant 0.000000e+00 : f32
    %149 = vector.broadcast %cst_56 : f32 to vector<8x32xf32>
    %150 = arith.maximumf %148, %149 : vector<8x32xf32>
    %c0_57 = arith.constant 0 : index
    %c0_58 = arith.constant 0 : index
    %c0_59 = arith.constant 0 : index
    %c0_60 = arith.constant 0 : index
    %151 = vector.load %arg9[%c0_57, %c0_58, %c0_59, %c0_60] : memref<1x2x32x32xf32, #tpu.memory_space<vmem>>, vector<1x1x32x32xf32>
    %152 = vector.shape_cast %151 : vector<1x1x32x32xf32> to vector<32x32xf32>
    %cst_61 = arith.constant dense<0.000000e+00> : vector<8x32xf32>
    %153 = tpu.matmul %141, %152, %cst_61 {dimension_numbers = #tpu.dot_dimension_numbers<[1], [0], [0], [1], [0, 0, 1, 1], [], []>} : vector<8x32xf32>, vector<32x32xf32>, vector<8x32xf32> -> vector<8x32xf32>
    %c0_62 = arith.constant 0 : index
    %c0_63 = arith.constant 0 : index
    %c0_64 = arith.constant 0 : index
    %c0_65 = arith.constant 0 : index
    %154 = vector.load %arg10[%c0_62, %c0_63, %c0_64, %c0_65] : memref<1x2x1x32xf32, #tpu.memory_space<vmem>>, vector<1x1x1x32xf32>
    %155 = vector.shape_cast %154 : vector<1x1x1x32xf32> to vector<1x32xf32>
    %156 = vector.broadcast %155 : vector<1x32xf32> to vector<8x32xf32>
    %157 = arith.addf %153, %156 : vector<8x32xf32>
    %158 = arith.negf %157 : vector<8x32xf32>
    %159 = math.exp %158 : vector<8x32xf32>
    %cst_66 = arith.constant 1.000000e+00 : f32
    %160 = vector.broadcast %cst_66 : f32 to vector<8x32xf32>
    %161 = arith.addf %160, %159 : vector<8x32xf32>
    %162 = arith.divf %160, %161 : vector<8x32xf32>
    %163 = arith.mulf %162, %141 : vector<8x32xf32>
    %cst_67 = arith.constant 1.000000e+00 : f32
    %164 = vector.broadcast %cst_67 : f32 to vector<8x32xf32>
    %165 = arith.subf %164, %162 : vector<8x32xf32>
    %166 = arith.mulf %165, %150 : vector<8x32xf32>
    %167 = arith.addf %163, %166 : vector<8x32xf32>
    %c0_68 = arith.constant 0 : index
    %c1_69 = arith.constant 1 : index
    %c0_70 = arith.constant 0 : index
    %c0_71 = arith.constant 0 : index
    %168 = vector.load %arg7[%c0_68, %c1_69, %c0_70, %c0_71] : memref<1x2x32x32xf32, #tpu.memory_space<vmem>>, vector<1x1x32x32xf32>
    %169 = vector.shape_cast %168 : vector<1x1x32x32xf32> to vector<32x32xf32>
    %cst_72 = arith.constant dense<0.000000e+00> : vector<8x32xf32>
    %170 = tpu.matmul %167, %169, %cst_72 {dimension_numbers = #tpu.dot_dimension_numbers<[1], [0], [0], [1], [0, 0, 1, 1], [], []>} : vector<8x32xf32>, vector<32x32xf32>, vector<8x32xf32> -> vector<8x32xf32>
    %c0_73 = arith.constant 0 : index
    %c1_74 = arith.constant 1 : index
    %c0_75 = arith.constant 0 : index
    %c0_76 = arith.constant 0 : index
    %171 = vector.load %arg8[%c0_73, %c1_74, %c0_75, %c0_76] : memref<1x2x1x32xf32, #tpu.memory_space<vmem>>, vector<1x1x1x32xf32>
    %172 = vector.shape_cast %171 : vector<1x1x1x32xf32> to vector<1x32xf32>
    %173 = vector.broadcast %172 : vector<1x32xf32> to vector<8x32xf32>
    %174 = arith.addf %170, %173 : vector<8x32xf32>
    %cst_77 = arith.constant 0.000000e+00 : f32
    %175 = vector.broadcast %cst_77 : f32 to vector<8x32xf32>
    %176 = arith.maximumf %174, %175 : vector<8x32xf32>
    %c0_78 = arith.constant 0 : index
    %c1_79 = arith.constant 1 : index
    %c0_80 = arith.constant 0 : index
    %c0_81 = arith.constant 0 : index
    %177 = vector.load %arg9[%c0_78, %c1_79, %c0_80, %c0_81] : memref<1x2x32x32xf32, #tpu.memory_space<vmem>>, vector<1x1x32x32xf32>
    %178 = vector.shape_cast %177 : vector<1x1x32x32xf32> to vector<32x32xf32>
    %cst_82 = arith.constant dense<0.000000e+00> : vector<8x32xf32>
    %179 = tpu.matmul %167, %178, %cst_82 {dimension_numbers = #tpu.dot_dimension_numbers<[1], [0], [0], [1], [0, 0, 1, 1], [], []>} : vector<8x32xf32>, vector<32x32xf32>, vector<8x32xf32> -> vector<8x32xf32>
    %c0_83 = arith.constant 0 : index
    %c1_84 = arith.constant 1 : index
    %c0_85 = arith.constant 0 : index
    %c0_86 = arith.constant 0 : index
    %180 = vector.load %arg10[%c0_83, %c1_84, %c0_85, %c0_86] : memref<1x2x1x32xf32, #tpu.memory_space<vmem>>, vector<1x1x1x32xf32>
    %181 = vector.shape_cast %180 : vector<1x1x1x32xf32> to vector<1x32xf32>
    %182 = vector.broadcast %181 : vector<1x32xf32> to vector<8x32xf32>
    %183 = arith.addf %179, %182 : vector<8x32xf32>
    %184 = arith.negf %183 : vector<8x32xf32>
    %185 = math.exp %184 : vector<8x32xf32>
    %cst_87 = arith.constant 1.000000e+00 : f32
    %186 = vector.broadcast %cst_87 : f32 to vector<8x32xf32>
    %187 = arith.addf %186, %185 : vector<8x32xf32>
    %188 = arith.divf %186, %187 : vector<8x32xf32>
    %189 = arith.mulf %188, %167 : vector<8x32xf32>
    %cst_88 = arith.constant 1.000000e+00 : f32
    %190 = vector.broadcast %cst_88 : f32 to vector<8x32xf32>
    %191 = arith.subf %190, %188 : vector<8x32xf32>
    %192 = arith.mulf %191, %176 : vector<8x32xf32>
    %193 = arith.addf %189, %192 : vector<8x32xf32>
    %c0_89 = arith.constant 0 : index
    %c0_90 = arith.constant 0 : index
    %c0_91 = arith.constant 0 : index
    %c0_92 = arith.constant 0 : index
    %194 = vector.load %arg12[%c0_89, %c0_90, %c0_91, %c0_92] : memref<1x1x8x32xf32, #tpu.memory_space<vmem>>, vector<1x1x8x32xf32>
    %195 = vector.shape_cast %194 : vector<1x1x8x32xf32> to vector<8x32xf32>
    %196 = vector.shape_cast %193 : vector<8x32xf32> to vector<1x1x8x32xf32>
    tpu.vector_store %arg12[%c0_89, %c0_90, %c0_91, %c0_92], %196 {strides = array<i32>} : memref<1x1x8x32xf32, #tpu.memory_space<vmem>>, vector<1x1x8x32xf32>,
    return
  }
  func.func @transform_0(%arg0: i32, %arg1: i32) -> (i32, i32, i32, i32) {
    %c0_i32 = arith.constant 0 : i32
    %c0_i32_0 = arith.constant 0 : i32
    %c0_i32_1 = arith.constant 0 : i32
    return %arg0, %arg1, %c0_i32, %c0_i32_0 : i32, i32, i32, i32
  }
  func.func @transform_1(%arg0: i32, %arg1: i32) -> (i32, i32, i32) {
    %c0_i32 = arith.constant 0 : i32
    %c0_i32_0 = arith.constant 0 : i32
    %c0_i32_1 = arith.constant 0 : i32
    return %arg0, %c0_i32, %c0_i32_0 : i32, i32, i32
  }
  func.func @transform_2(%arg0: i32, %arg1: i32) -> (i32, i32, i32) {
    %c0_i32 = arith.constant 0 : i32
    %c0_i32_0 = arith.constant 0 : i32
    %c0_i32_1 = arith.constant 0 : i32
    return %arg0, %c0_i32, %c0_i32_0 : i32, i32, i32
  }
  func.func @transform_3(%arg0: i32, %arg1: i32) -> (i32, i32, i32) {
    %c0_i32 = arith.constant 0 : i32
    %c0_i32_0 = arith.constant 0 : i32
    %c0_i32_1 = arith.constant 0 : i32
    return %arg0, %c0_i32, %c0_i32_0 : i32, i32, i32
  }
  func.func @transform_4(%arg0: i32, %arg1: i32) -> (i32, i32, i32) {
    %c0_i32 = arith.constant 0 : i32
    %c0_i32_0 = arith.constant 0 : i32
    %c0_i32_1 = arith.constant 0 : i32
    return %arg0, %c0_i32, %c0_i32_0 : i32, i32, i32
  }
  func.func @transform_5(%arg0: i32, %arg1: i32) -> (i32, i32, i32, i32) {
    %c0_i32 = arith.constant 0 : i32
    %c0_i32_0 = arith.constant 0 : i32
    %c0_i32_1 = arith.constant 0 : i32
    %c0_i32_2 = arith.constant 0 : i32
    return %arg0, %c0_i32, %c0_i32_0, %c0_i32_1 : i32, i32, i32, i32
  }
  func.func @transform_6(%arg0: i32, %arg1: i32) -> (i32, i32, i32, i32) {
    %c0_i32 = arith.constant 0 : i32
    %c0_i32_0 = arith.constant 0 : i32
    %c0_i32_1 = arith.constant 0 : i32
    %c0_i32_2 = arith.constant 0 : i32
    return %arg0, %c0_i32, %c0_i32_0, %c0_i32_1 : i32, i32, i32, i32
  }
  func.func @transform_7(%arg0: i32, %arg1: i32) -> (i32, i32, i32, i32) {
    %c0_i32 = arith.constant 0 : i32
    %c0_i32_0 = arith.constant 0 : i32
    %c0_i32_1 = arith.constant 0 : i32
    %c0_i32_2 = arith.constant 0 : i32
    return %arg0, %c0_i32, %c0_i32_0, %c0_i32_1 : i32, i32, i32, i32
  }
  func.func @transform_8(%arg0: i32, %arg1: i32) -> (i32, i32, i32, i32) {
    %c0_i32 = arith.constant 0 : i32
    %c0_i32_0 = arith.constant 0 : i32
    %c0_i32_1 = arith.constant 0 : i32
    %c0_i32_2 = arith.constant 0 : i32
    return %arg0, %c0_i32, %c0_i32_0, %c0_i32_1 : i32, i32, i32, i32
  }
  func.func @transform_9(%arg0: i32, %arg1: i32) -> (i32, i32) {
    %c0_i32 = arith.constant 0 : i32
    %c0_i32_0 = arith.constant 0 : i32
    %c0_i32_1 = arith.constant 0 : i32
    return %c0_i32, %c0_i32_0 : i32, i32
  }
  func.func @transform_10(%arg0: i32, %arg1: i32) -> (i32, i32, i32, i32) {
    %c0_i32 = arith.constant 0 : i32
    %c0_i32_0 = arith.constant 0 : i32
    %c0_i32_1 = arith.constant 0 : i32
    return %arg0, %arg1, %c0_i32, %c0_i32_0 : i32, i32, i32, i32
  }
}

</mosaic_0001>

<bundles_post_ra>
// kernel: self_attentive_lbl_bilm_forward_pallas.2
= control target key start
LH: loop header
LB: loop body
LE: loop exit
PB: predicated region body
PF: predicated region fallthrough
CT: control target
= control target key end

     0   :  { %s3202_s0 = inlined_call_operand.vmem [shape: f32[2,2,14,32], index: 0, kind: input, shape index: {}]   ;;  %s3203_s1 = inlined_call_operand.vmem [shape: f32[2,32,96], index: 1, kind: input, shape index: {}]   ;;  %s3204_s2 = inlined_call_operand.vmem [shape: f32[2,1,96], index: 2, kind: input, shape index: {}]   ;;  %s3205_s3 = inlined_call_operand.vmem [shape: f32[2,32,32], index: 3, kind: input, shape index: {}]   ;;  %s3206_s4 = inlined_call_operand.vmem [shape: f32[2,1,32], index: 4, kind: input, shape index: {}]   ;;  %s3207_s5 = inlined_call_operand.vmem [shape: f32[2,2,32,32], index: 5, kind: input, shape index: {}]   ;;  %s3208_s6 = inlined_call_operand.vmem [shape: f32[2,2,1,32], index: 6, kind: input, shape index: {}]   ;;  %s3209_s7 = inlined_call_operand.vmem [shape: f32[2,2,32,32], index: 7, kind: input, shape index: {}]   ;;  %s3210_s8 = inlined_call_operand.vmem [shape: f32[2,2,1,32], index: 8, kind: input, shape index: {}]   ;;  %s3211_s9 = inlined_call_operand.vmem [shape: f32[2,7], index: 9, kind: input, shape index: {}]   ;;  %s3212_s10 = inlined_call_operand.vmem [shape: f32[2,2,8,32], index: 10, kind: output, shape index: {}]  }
   0x1   :  { %3213 = sst [smem:[#allocation6_spill]] %s3202_s0 }
   0x2   :  { %3214 = sst [smem:[#allocation7_spill]] %s3203_s1 }
   0x3   :  { %3215 = sst [smem:[#allocation8_spill]] %s3204_s2 }
   0x4   :  { %3216 = sst [smem:[#allocation9_spill]] %s3205_s3 }
   0x5   :  { %3217 = sst [smem:[#allocation10_spill]] %s3207_s5 }
   0x6   :  { %15 = vsyncpa [#allocation4], 0  ;;  %s2879_s13 = smov 0   ;;  %s2881_s14 = smov 0  }
   0x7   :  { %s2883_s15 = smov 0   ;;  %s2885_s16 = smov 0  }
   0x8   :  { %s2887_s17 = smov 0  }
   0x9 LB: > { %s2240_s18 = sadd.s32 4294967295, %s2803_s17   ;;  %s30_s19 = sadd.s32 1, %s2795_s15  ;;  %s2803_s17 = sphi %s2887_s17, %s21_s17   ;;  %s2799_s16 = sphi %s2885_s16, %s3236_s16   ;;  %s2795_s15 = sphi %s2883_s15, %s3235_s15   ;;  %s2791_s14 = sphi %s2881_s14, %s3234_s14   ;;  %s2787_s13 = sphi %s2879_s13, %s3233_s13  }
   0xa   : > { %p31_p0 = scmp.ge.s32.totalorder %s30_s19, 2  ;;  %s33_s20 = sadd.s32 1, %s2799_s16 }
   0xb   : > { %p2242_p1 = scmp.ge.s32.totalorder %s2803_s17, 1  ;;  %p323_p2 = scmp.lt.s32.totalorder %s2803_s17, 5 }
   0xc   : > { %s3238_s19 = smov (%p31_p0, %s30_s19), 0  ;;  %s3240_s20 = smov (!%p31_p0, %s33_s20), %s2799_s16 }
   0xd   : > { %p2912_p3 = pnand %p2242_p1, %p323_p2  ;;  %p35_p4 = scmp.ge.s32.totalorder %s3240_s20, 2 }
   0xe   : > { %p2916_p5 = scmp.eq.s32.totalorder %s2240_s18, 0  ;;  %s336_s25 = sshll.u32 %s3211_s9, 4  ;;  %s337_s25 = int_to_ptr.vmem [resolvable:$true] %s336_s25 }
   0xf   : > { %p2601_p6 = pneg %p2912_p3  ;;  %s3242_s20 = smov (%p35_p4, %s3240_s20), 0 }
  0x10   : > { %s2746_s26 = scalar_lea.vmem %s337_s25, 32  ;;  %p2754_p12 = scmp.lt.s32.totalorder %s337_s25, %s337_s25 }
  0x11   : > { %p2602_p7 = pnand %p2916_p5, %p2601_p6  ;;  %p2747_p8 = scmp.ne.s32.totalorder %s337_s25, %s2746_s26 }
  0x12   : > { %p2755_p13 = scmp.lt.s32.totalorder %s2746_s26, %s2746_s26 }
  0x13   : > { %p2748_p9 = pneg %p2602_p7 }
  0x14   : > { %p2756_p0 = por %p2755_p13, %p2754_p12 }
  0x15   : > { %p2749_p10 = pnand %p2748_p9, %p2747_p8 }
  0x17   : > { %p2750_p11 = pneg %p2749_p10 }
  0x19   : > { %p2757_p1 = pnand %p2756_p0, %p2750_p11 }
  0x1b   : > { %2760 = shalt.err (!%p2757_p1)
}
  0x1c   : > { %s2805_s27 = smov [#allocation3]   ;;  %419 = sbr.rel (%p2912_p3) target bundleno = 3612 (0xe1c), region = 60 }
  0x1d   : > { %2604 = dma.vmem_to_smem (!%p2602_p7), %s337_s25, 32, %s2805_s27, [#allocation4]  }
  0x23   : > { %2782 = dma.done.wait (%p2916_p5), [#allocation4], 32  }
  0x24   : > { %2784 = vsyncadd (%p2916_p5), [#allocation4], 4294967264 }
  0x25   : > { %425 = sfence }
  0x26   : > { %p499_p2 = scmp.lt.s32.totalorder %s2791_s14, 1  ;;  %p501_p4 = scmp.lt.s32.totalorder %s2787_s13, 1  ;;  %vm563_vm0 = vcmask 261120   ;;  %vm669_vm1 = vcmask 64512   ;;  %v645_v19 = vlaneseq  ;;  %vm759_vm9 = vcmask 111616  }
  0x27   : > { %s3220_s1 = sld [smem:[#allocation7_spill]]  ;;  %s3221_s0 = sld [smem:[#allocation6_spill]]  ;;  %vm2973_vm2 = vmpackc.low %vm669_vm1, %vm669_vm1  ;;  %vm755_vm10 = vcmask 113664   ;;  %vm790_vm11 = vcmask 1045504   ;;  %vm2810_vm12 = vmmov 1   ;;  %vm869_vm14 = vcmask 62464  }
  0x28   : > { %s2938_s28 = scalar_select %p499_p2, %s2791_s14, 1  ;;  %v646_v20 = vshrl.u32 %v645_v19, 7  ;;  %v649_v22 = vand.u32 127, %v645_v19  ;;  %vm3002_vm13 = vmpackc.low %vm790_vm11, %vm2810_vm12  ;;  %vm1082_vm15 = vcmask 130112   ;;  %vm1685_vm12 = vcmask 1041408  }
  0x29   : > { %s3244_s13 = smov (!%p501_p4, %s2787_s13), 1  ;;  %s3222_s2 = sld [smem:[#allocation8_spill]] }
  0x2a   : > { %s2319_s29 = sshll.u32 %s2938_s28, 5  ;;  %s2248_s30 = sshll.u32 %s2938_s28, 2  ;;  %v647_v21 = vadd.s32 8, %v646_v20  ;;  %v650_v26 = vsub.s32 %v649_v22, %v646_v20 }
  0x2b   : > { %s2247_s21 = sshll.u32 %s3244_s13, 1  ;;  %s2806_s12 = smov 96  }
  0x2c   : > { %s505_s22 = sadd.s32 %s2248_s30, %s2247_s21  ;;  %p652_p3 = scmp.eq.s32.totalorder %s2791_s14, 0  ;;  %v651_v23 = vsub.s32 %v649_v22, %v647_v21 }
  0x2d   : > { %s512_s18 = scalar_lea.vmem %s3220_s1, %s2319_s29  ;;  %s2249_s23 = sshll.u32 %s505_s22, 3 }
  0x2e   : > { %v552_v0 = vld [vmem:[%s512_s18] sm:$0xff]  ;;  %v553_v1 = vld [vmem:[%s512_s18 + $0x8] sm:$0xff]  ;;  %v554_v2 = vld [vmem:[%s512_s18 + $0x10] sm:$0xff]  ;;  %s507_s26 = scalar_lea.vmem %s3221_s0, %s2249_s23  ;;  %s2807_s22 = smov 64  }
  0x2f   : > { %v2509_v3 = vpack.c.bf16 %v553_v1, %v552_v0  ;;  %v555_v4 = vld [vmem:[%s512_s18 + $0x18] sm:$0xff]  ;;  %v550_v6 = vld [vmem:[%s507_s26] sm:$0xff]  ;;  %v551_v7 = vld [vmem:[%s507_s26 + $0x8] sm:$0x3f]  ;;  %s515_s30 = scalar_lea.vmem %s3222_s2, %s2938_s28  ;;  %s2808_s23 = smov 88  }
  0x30   : > { %v2513_v5 = vpack.c.bf16 %v555_v4, %v554_v2  ;;  %2395 = vmatprep.mubr.msk.f32.mxu0 %vm563_vm0, %v550_v6  ;;  %v2262_v8 = vld [vmem:[%s515_s30] ss:$0 sm:$0xff]  ;;  %s653_s18 = scalar_select %p652_p3, 4294967292, 0 }
  0x31   : > { %2510 = vmatprep.subr.bf16.mxu0 %v2509_v3  ;;  %s654_s21 = scalar_select %p652_p3, 0, 4 }
  0x32   : > { %2512 = vmatpush3.bf16.msra.mxu0 %v2509_v3  ;;  %v655_v24 = vstv %s653_s18  ;;  %s2809_s24 = smov 120   ;;  %s2811_s25 = smov 56  }
  0x33   : > { %2514 = vmatprep.subr.bf16.mxu0 %v2513_v5  ;;  %v658_v25 = vstv %s654_s21  ;;  %vm657_vm3 = vcmp.ge.s32.totalorder %v651_v23, %v655_v24  ;;  %vm656_vm5 = vcmp.ge.s32.totalorder %v650_v26, %v655_v24  ;;  %s2812_s26 = smov 80   ;;  %s2813_s27 = smov 112  }
  0x34   : > { %vm660_vm4 = vcmp.le.s32.totalorder %v651_v23, %v658_v25  ;;  %vm659_vm6 = vcmp.le.s32.totalorder %v650_v26, %v658_v25  ;;  %s2814_s11 = smov 72   ;;  %s2815_s30 = smov 104  }
  0x35   : > { %vm2984_vm7 = vmand %vm657_vm3, %vm660_vm4  ;;  %s2817_s18 = smov 8   ;;  %s2818_s21 = smov 40   ;;  %vm1299_vm3 = vcmask 193664   ;;  %vm1514_vm4 = vcmask 259264  }
  0x36   : > { %2516 = vmatpush3.bf16.msra.mxu0 %v2513_v5  ;;  %vm2988_vm8 = vmand %vm656_vm5, %vm659_vm6  ;;  %s3231_s3 = sld [smem:[#allocation9_spill]]  ;;  %vm1512_vm5 = vcmask 261312   ;;  %s3232_s5 = sld [smem:[#allocation10_spill]]  ;;  %vm2822_vm6 = vmmov 0  }
  0x39   : > { %2396 = vmatmul.mubr.msk.f32.vlgmr.msra.gmra.mrb[0].mxu0 %vm563_vm0, %v551_v7 }
 0x10c   : > { %v2397_v9 = vpop.f32.mrb[0].mxu0 }
 0x10d   : > { %v2960_v10 = vadd.f32 %v2397_v9, %v2262_v8  ;;  %v636_v11 = vpop.f32.mrb[1].mxu0 }
 0x10e   : > { %v2962_v12 = vadd.f32 %v2262_v8, %v636_v11 }
 0x110   : > { %2402 = vmatprep.mubr.msk.f32.mxu1 %vm669_vm1, %v2962_v12  ;;  %v2968_v13 = vpack.i.bf16 %v2960_v10, %v2962_v12 }
 0x112   : > { %2667 = vrot.lane.b32.xlu0 %v2968_v13, %s2806_s12  ;;  %s2816_s12 = smov 48  }
 0x184   : > { %v2668_v14 = vpop.permute.xlu0 %2667 }
 0x185   : > { %v2670_v15 = vunpack.i.h.bf16 %v2668_v14  ;;  %v2669_v16 = vunpack.i.l.bf16 %v2668_v14 }
 0x187   : > { %v2517_v18 = vpack.c.bf16 %v2670_v15, %v2669_v16 }
 0x189   : > { %2519 = vmatprep.subr.msk.bf16.mxu1 %vm2973_vm2, %v2517_v18 }
 0x18a   : > { %2522 = vmatpush3.bf16.xpose.msk.msra.mxu1 %vm2973_vm2, %v2517_v18 }
 0x191   : > { %2403 = vmatmul.mubr.msk.f32.vlgmr.msra.gmra.mrb[0].mxu1 %vm669_vm1, %v2960_v10 }
 0x264   : > { %v2404_v29 = vpop.f32.mrb[0].mxu1 }
 0x265   : > { %v754_v30 = vsel %vm2984_vm7, %v2404_v29, -1e+09  ;;  %v744_v31 = vpop.f32.mrb[1].mxu1 }
 0x266   : > { %v753_v32 = vsel %vm2988_vm8, %v744_v31, -1e+09  ;;  %v760_v33 = vsel %vm759_vm9, %v754_v30, -inf }
 0x267   : > { %761 = vmax.xlane.f32.xlu1 %v760_v33  ;;  %v756_v34 = vsel %vm755_vm10, %v753_v32, -inf }
 0x268   : > { %757 = vmax.xlane.f32.xlu0 %v756_v34 }
 0x278   : > { %2672 = vrot.lane.b32.xlu1 %v2968_v13, %s2807_s22  ;;  %s2819_s22 = smov 16  }
 0x27c   : > { %2677 = vrot.lane.b32.xlu1 %v2968_v13, %s2808_s23 }
 0x27e   : > { %873 = vrot.lane.b32.xlu0 %v2960_v10, %s2809_s24 }
 0x2f4   : > { %v762_v35 = vpop.xlane.xlu1 %761 }
 0x2f5   : > { %v764_v36 = vsub.f32 %v754_v30, %v762_v35  ;;  %v758_v37 = vpop.xlane.xlu0 %757 }
 0x2f6   : > { %v763_v38 = vsub.f32 %v753_v32, %v758_v37 }
 0x2f7   : > { %v767_v39 = vmul.f32 1.442695, %v764_v36 }
 0x2f8   : > { %v765_v40 = vmul.f32 1.442695, %v763_v38  ;;  %v2673_v41 = vpop.permute.xlu1 %2672 }
 0x2f9   : > { %2706 = vpow2.f32 %v767_v39  ;;  %v2675_v42 = vunpack.i.h.bf16 %v2673_v41  ;;  %v2674_v43 = vunpack.i.l.bf16 %v2673_v41  ;;  %v874_v61 = vpop.permute.xlu0 %873 }
 0x2fa   : > { %2708 = vpow2.f32 %v765_v40 }
 0x2fb   : > { %v2523_v45 = vpack.c.bf16 %v2675_v42, %v2674_v43 }
 0x2fc   : > { %v2678_v46 = vpop.permute.xlu1 %2677 }
 0x2fd   : > { %v2680_v47 = vunpack.i.h.bf16 %v2678_v46  ;;  %v2679_v48 = vunpack.i.l.bf16 %v2678_v46  ;;  %2525 = vmatprep.subr.msk.bf16.mxu1 %vm3002_vm13, %v2523_v45 }
 0x2fe   : > { %2528 = vmatpush3.bf16.msk.msra.mxu1 %vm3002_vm13, %v2523_v45 }
 0x2ff   : > { %v2529_v49 = vpack.c.bf16 %v2680_v47, %v2679_v48 }
 0x301   : > { %2531 = vmatprep.subr.msk.bf16.mxu1 %vm2973_vm2, %v2529_v49 }
 0x303   : > { %v2707_v50 = vpop.eup %2706 }
 0x304   : > { %v772_v51 = vsel %vm759_vm9, %v2707_v50, 0.0  ;;  %v2709_v52 = vpop.eup %2708 }
 0x305   : > { %773 = vadd.xlane.f32.xlu1 %v772_v51  ;;  %v769_v53 = vsel %vm755_vm10, %v2709_v52, 0.0 }
 0x309   : > { %770 = vadd.xlane.f32.xlu1 %v769_v53 }
 0x31a   : > { %871 = vrot.lane.b32.xlu1 %v2962_v12, %s2809_s24 }
 0x392   : > { %v774_v54 = vpop.xlane.xlu1 %773 }
 0x393   : > { %2710 = vrcp.f32 %v774_v54 }
 0x396   : > { %v771_v55 = vpop.xlane.xlu1 %770 }
 0x397   : > { %2712 = vrcp.f32 %v771_v55 }
 0x39a   : > { %v872_v60 = vpop.permute.xlu1 %871 }
 0x39d   : > { %v2711_v56 = vpop.eup %2710 }
 0x39e   : > { %v778_v59 = vmul.f32 %v2711_v56, %v2707_v50 }
 0x3a1   : > { %v2713_v57 = vpop.eup %2712 }
 0x3a2   : > { %v777_v58 = vmul.f32 %v2713_v57, %v2709_v52 }
 0x3a4   : > { %2409 = vmatprep.mubr.msk.f32.mxu1 %vm755_vm10, %v777_v58 }
 0x3a5   : > { %2410 = vmatmul.mubr.msk.f32.vlgmr.msra.gmra.mrb[2].mxu1 %vm755_vm10, %v778_v59 }
 0x3a6   : > { %2534 = vmatpush3.bf16.xpose.msk.msra.mxu1 %vm2973_vm2, %v2529_v49  ;;  %2416 = vmatprep.mubr.msk.f32.mxu1 %vm669_vm1, %v872_v60 }
 0x3ad   : > { %2417 = vmatmul.mubr.msk.f32.vlgmr.msra.gmra.mrb[4].mxu1 %vm669_vm1, %v874_v61 }
 0x478   : > { %v2411_v62 = vpop.f32.mrb[2].mxu1 }
 0x479   : > { %870 = vst.msk [vmem:[#allocation2 + $0x8] sm:$0x3f] %vm869_vm14, %v2411_v62  ;;  %v859_v63 = vpop.f32.mrb[3].mxu1 }
 0x47a   : > { %868 = vst.msk [vmem:[#allocation2] sm:$0xff] %vm669_vm1, %v859_v63 }
 0x480   : > { %v2418_v0 = vpop.f32.mrb[4].mxu1 }
 0x481   : > { %v963_v1 = vsel %vm2984_vm7, %v2418_v0, -1e+09  ;;  %v953_v2 = vpop.f32.mrb[5].mxu1 }
 0x482   : > { %v962_v3 = vsel %vm2988_vm8, %v953_v2, -1e+09  ;;  %v967_v4 = vsel %vm759_vm9, %v963_v1, -inf }
 0x483   : > { %968 = vmax.xlane.f32.xlu0 %v967_v4  ;;  %v964_v5 = vsel %vm755_vm10, %v962_v3, -inf }
 0x484   : > { %965 = vmax.xlane.f32.xlu1 %v964_v5 }
 0x495   : > { %2682 = vrot.lane.b32.xlu1 %v2968_v13, %s2811_s25  ;;  %s520_s25 = scalar_lea.vmem %s3231_s3, %s2319_s29  ;;  %s2321_s29 = sshll.u32 %s2938_s28, 6 }
 0x496   : > { %v1521_v44 = vld [vmem:[%s520_s25 + $0x18] sm:$0xff] }
 0x499   : > { %2687 = vrot.lane.b32.xlu0 %v2968_v13, %s2812_s26  ;;  %1086 = vrot.lane.b32.xlu1 %v2962_v12, %s2813_s27  ;;  %s2820_s26 = smov 24  }
 0x510   : > { %v969_v6 = vpop.xlane.xlu0 %968 }
 0x511   : > { %v971_v7 = vsub.f32 %v963_v1, %v969_v6  ;;  %v966_v8 = vpop.xlane.xlu1 %965 }
 0x512   : > { %v970_v9 = vsub.f32 %v962_v3, %v966_v8 }
 0x513   : > { %v974_v11 = vmul.f32 1.442695, %v971_v7 }
 0x514   : > { %v972_v14 = vmul.f32 1.442695, %v970_v9  ;;  %v2688_v15 = vpop.permute.xlu0 %2687 }
 0x515   : > { %2714 = vpow2.f32 %v974_v11  ;;  %v2683_v16 = vpop.permute.xlu1 %2682  ;;  %v2690_v18 = vunpack.i.h.bf16 %v2688_v15  ;;  %v2689_v19 = vunpack.i.l.bf16 %v2688_v15 }
 0x516   : > { %v2685_v20 = vunpack.i.h.bf16 %v2683_v16  ;;  %v2684_v21 = vunpack.i.l.bf16 %v2683_v16  ;;  %2716 = vpow2.f32 %v972_v14 }
 0x517   : > { %v2541_v23 = vpack.c.bf16 %v2690_v18, %v2689_v19 }
 0x518   : > { %v2535_v22 = vpack.c.bf16 %v2685_v20, %v2684_v21 }
 0x519   : > { %v1087_v30 = vpop.permute.xlu1 %1086 }
 0x51a   : > { %2537 = vmatprep.subr.msk.bf16.mxu0 %vm3002_vm13, %v2535_v22 }
 0x51b   : > { %2540 = vmatpush3.bf16.msk.msra.mxu0 %vm3002_vm13, %v2535_v22 }
 0x51c   : > { %2543 = vmatprep.subr.msk.bf16.mxu0 %vm2973_vm2, %v2541_v23 }
 0x51f   : > { %v2715_v24 = vpop.eup %2714 }
 0x520   : > { %v979_v25 = vsel %vm759_vm9, %v2715_v24, 0.0  ;;  %v2717_v26 = vpop.eup %2716 }
 0x521   : > { %980 = vadd.xlane.f32.xlu1 %v979_v25  ;;  %v976_v29 = vsel %vm755_vm10, %v2717_v26, 0.0 }
 0x525   : > { %977 = vadd.xlane.f32.xlu1 %v976_v29 }
 0x536   : > { %1088 = vrot.lane.b32.xlu1 %v2960_v10, %s2813_s27 }
 0x5ae   : > { %v981_v31 = vpop.xlane.xlu1 %980 }
 0x5af   : > { %2718 = vrcp.f32 %v981_v31 }
 0x5b2   : > { %v978_v32 = vpop.xlane.xlu1 %977 }
 0x5b3   : > { %2720 = vrcp.f32 %v978_v32 }
 0x5b6   : > { %v1089_v37 = vpop.permute.xlu1 %1088 }
 0x5b9   : > { %v2719_v33 = vpop.eup %2718 }
 0x5ba   : > { %v985_v36 = vmul.f32 %v2719_v33, %v2715_v24 }
 0x5bd   : > { %v2721_v34 = vpop.eup %2720 }
 0x5be   : > { %v984_v35 = vmul.f32 %v2721_v34, %v2717_v26 }
 0x5c0   : > { %2423 = vmatprep.mubr.msk.f32.mxu0 %vm755_vm10, %v984_v35 }
 0x5c1   : > { %2424 = vmatmul.mubr.msk.f32.vlgmr.msra.gmra.mrb[2].mxu0 %vm755_vm10, %v985_v36 }
 0x5c2   : > { %2546 = vmatpush3.bf16.xpose.msk.msra.mxu0 %vm2973_vm2, %v2541_v23  ;;  %2430 = vmatprep.mubr.msk.f32.mxu0 %vm669_vm1, %v1087_v30 }
 0x5c9   : > { %2431 = vmatmul.mubr.msk.f32.vlgmr.msra.gmra.mrb[4].mxu0 %vm669_vm1, %v1089_v37 }
 0x694   : > { %v3046_v38 = vpop.f32.mrb[2].mxu0 }
 0x695   : > { %v3048_v39 = vpop.f32.mrb[3].mxu0 }
 0x69c   : > { %v2432_v40 = vpop.f32.mrb[4].mxu0 }
 0x69d   : > { %v1178_v41 = vsel %vm2984_vm7, %v2432_v40, -1e+09  ;;  %v1168_v42 = vpop.f32.mrb[5].mxu0 }
 0x69e   : > { %v1177_v43 = vsel %vm2988_vm8, %v1168_v42, -1e+09  ;;  %v1182_v45 = vsel %vm759_vm9, %v1178_v41, -inf  ;;  %v1519_v42 = vld [vmem:[%s520_s25 + $0x8] sm:$0xff] }
 0x69f   : > { %1183 = vmax.xlane.f32.xlu0 %v1182_v45  ;;  %v1179_v46 = vsel %vm755_vm10, %v1177_v43, -inf  ;;  %v1520_v45 = vld [vmem:[%s520_s25 + $0x10] sm:$0xff] }
 0x6a0   : > { %1180 = vmax.xlane.f32.xlu1 %v1179_v46  ;;  %v2569_v46 = vpack.c.bf16 %v1521_v44, %v1520_v45 }
 0x72c   : > { %v1184_v47 = vpop.xlane.xlu0 %1183 }
 0x72d   : > { %v1186_v48 = vsub.f32 %v1178_v41, %v1184_v47  ;;  %v1181_v49 = vpop.xlane.xlu1 %1180  ;;  %v1518_v41 = vld [vmem:[%s520_s25] sm:$0xff] }
 0x72e   : > { %v1185_v50 = vsub.f32 %v1177_v43, %v1181_v49  ;;  %v2565_v43 = vpack.c.bf16 %v1519_v42, %v1518_v41 }
 0x72f   : > { %v1189_v51 = vmul.f32 1.442695, %v1186_v48 }
 0x730   : > { %v1187_v52 = vmul.f32 1.442695, %v1185_v50 }
 0x731   : > { %2722 = vpow2.f32 %v1189_v51 }
 0x732   : > { %2724 = vpow2.f32 %v1187_v52 }
 0x73b   : > { %v2723_v53 = vpop.eup %2722 }
 0x73c   : > { %v2725_v54 = vpop.eup %2724  ;;  %v1194_v55 = vsel %vm759_vm9, %v2723_v53, 0.0 }
 0x73d   : > { %1195 = vadd.xlane.f32.xlu1 %v1194_v55  ;;  %v1191_v56 = vsel %vm755_vm10, %v2725_v54, 0.0 }
 0x73e   : > { %1192 = vadd.xlane.f32.xlu0 %v1191_v56 }
 0x74e   : > { %2697 = vrot.lane.b32.xlu1 %v2968_v13, %s2814_s11 }
 0x752   : > { %1301 = vrot.lane.b32.xlu1 %v2962_v12, %s2815_s30 }
 0x754   : > { %2692 = vrot.lane.b32.xlu0 %v2968_v13, %s2816_s12 }
 0x758   : > { %1303 = vrot.lane.b32.xlu0 %v2960_v10, %s2815_s30  ;;  %s3104_s30 = scalar_lea.vmem %s3232_s5, %s2321_s29  ;;  %s523_s5 = scalar_lea.vmem %s3206_s4, %s2938_s28 }
 0x759   : > { %v1692_v55 = vld [vmem:[%s3104_s30 + $0x8] sm:$0xff] }
 0x7ca   : > { %v1196_v57 = vpop.xlane.xlu1 %1195 }
 0x7cb   : > { %2726 = vrcp.f32 %v1196_v57  ;;  %v1193_v58 = vpop.xlane.xlu0 %1192  ;;  %v2823_v57 = vmov 0.0  }
 0x7cc   : > { %2728 = vrcp.f32 %v1193_v58 }
 0x7ce   : > { %v2698_v59 = vpop.permute.xlu1 %2697 }
 0x7cf   : > { %v2693_v60 = vpop.permute.xlu0 %2692  ;;  %v2700_v61 = vunpack.i.h.bf16 %v2698_v59  ;;  %v2699_v62 = vunpack.i.l.bf16 %v2698_v59 }
 0x7d0   : > { %v2695_v63 = vunpack.i.h.bf16 %v2693_v60  ;;  %v2694_v0 = vunpack.i.l.bf16 %v2693_v60  ;;  %v1693_v60 = vld [vmem:[%s3104_s30 + $0x10] sm:$0xff] }
 0x7d1   : > { %v2553_v2 = vpack.c.bf16 %v2700_v61, %v2699_v62  ;;  %v1694_v61 = vld [vmem:[%s3104_s30 + $0x18] sm:$0xff] }
 0x7d2   : > { %v2547_v1 = vpack.c.bf16 %v2695_v63, %v2694_v0  ;;  %v1302_v5 = vpop.permute.xlu1 %1301 }
 0x7d3   : > { %v1304_v6 = vpop.permute.xlu0 %1303 }
 0x7d4   : > { %2549 = vmatprep.subr.msk.bf16.mxu1 %vm3002_vm13, %v2547_v1 }
 0x7d5   : > { %v2727_v12 = vpop.eup %2726  ;;  %2552 = vmatpush3.bf16.msk.msra.mxu1 %vm3002_vm13, %v2547_v1  ;;  %v2577_v1 = vpack.c.bf16 %v1694_v61, %v1693_v60  ;;  %v2305_v60 = vld [vmem:[%s3104_s30 + $0x38] sm:$0xff] }
 0x7d6   : > { %v2729_v10 = vpop.eup %2728  ;;  %2555 = vmatprep.subr.msk.bf16.mxu1 %vm2973_vm2, %v2553_v2  ;;  %v1200_v4 = vmul.f32 %v2727_v12, %v2723_v53  ;;  %v2821_v53 = vmov 0.0|0.0   ;;  %v2293_v12 = vld [vmem:[%s523_s5] ss:$0 sm:$0xff] }
 0x7d7   : > { %v1199_v3 = vmul.f32 %v2729_v10, %v2725_v54  ;;  %v1691_v54 = vld [vmem:[%s3104_s30] sm:$0xff] }
 0x7d8   : > { %v2574_v58 = vpack.c.bf16 %v1692_v55, %v1691_v54  ;;  %v2303_v54 = vld [vmem:[%s3104_s30 + $0x28] sm:$0xff] }
 0x7d9   : > { %2437 = vmatprep.mubr.msk.f32.mxu1 %vm755_vm10, %v1199_v3 }
 0x7da   : > { %2438 = vmatmul.mubr.msk.f32.vlgmr.msra.gmra.mrb[6].mxu1 %vm755_vm10, %v1200_v4 }
 0x7db   : > { %2444 = vmatprep.mubr.msk.f32.mxu1 %vm669_vm1, %v1302_v5 }
 0x7de   : > { %2558 = vmatpush3.bf16.xpose.msk.msra.mxu1 %vm2973_vm2, %v2553_v2  ;;  %vm1297_vm2 = vcmask 195712  }
 0x7df   : > { %2573 = vmatprep.subr.bf16.mxu1 %v2821_v53 }
 0x7e5   : > { %2445 = vmatmul.mubr.msk.f32.vlgmr.msra.gmra.mrb[8].mxu1 %vm669_vm1, %v1304_v6  ;;  %vm1084_vm1 = vcmask 128064  }
 0x7e6   : > { %2473 = vmatprep.mubr.msk.f32.mxu1 %vm2822_vm6, %v2823_v57  ;;  %2575 = vmatpush3.bf16.msra.mxu1 %v2574_v58 }
 0x7e7   : > { %2576 = vmatprep.subr.bf16.mxu1 %v2821_v53 }
 0x7ea   : > { %2578 = vmatpush3.bf16.msra.mxu1 %v2577_v1 }
 0x7eb   : > { %2585 = vmatprep.subr.bf16.mxu1 %v2821_v53 }
 0x8ad   : > { %v2439_v7 = vpop.f32.mrb[6].mxu1 }
 0x8ae   : > { %v1280_v8 = vpop.f32.mrb[7].mxu1 }
 0x8b8   : > { %v2446_v9 = vpop.f32.mrb[8].mxu1 }
 0x8b9   : > { %v1393_v11 = vsel %vm2984_vm7, %v2446_v9, -1e+09  ;;  %v1383_v14 = vpop.f32.mrb[9].mxu1  ;;  %vm1621_vm7 = vcmask 1046528  }
 0x8ba   : > { %v1392_v15 = vsel %vm2988_vm8, %v1383_v14, -1e+09  ;;  %v1397_v16 = vsel %vm759_vm9, %v1393_v11, -inf  ;;  %vm1646_vm8 = vcmask 1044480  }
 0x8bb   : > { %1398 = vmax.xlane.f32.xlu0 %v1397_v16  ;;  %v1394_v18 = vsel %vm755_vm10, %v1392_v15, -inf }
 0x8bc   : > { %1395 = vmax.xlane.f32.xlu1 %v1394_v18 }
 0x948   : > { %v1399_v17 = vpop.xlane.xlu0 %1398 }
 0x949   : > { %v1401_v19 = vsub.f32 %v1393_v11, %v1399_v17  ;;  %v1396_v20 = vpop.xlane.xlu1 %1395 }
 0x94a   : > { %v1400_v21 = vsub.f32 %v1392_v15, %v1396_v20 }
 0x94b   : > { %v1404_v22 = vmul.f32 1.442695, %v1401_v19 }
 0x94c   : > { %v1402_v23 = vmul.f32 1.442695, %v1400_v21 }
 0x94d   : > { %2730 = vpow2.f32 %v1404_v22 }
 0x94e   : > { %2732 = vpow2.f32 %v1402_v23 }
 0x957   : > { %v2731_v27 = vpop.eup %2730 }
 0x958   : > { %v2733_v24 = vpop.eup %2732  ;;  %v1409_v25 = vsel %vm759_vm9, %v2731_v27, 0.0  ;;  %vm1659_vm9 = vcmask 1043456  }
 0x959   : > { %1410 = vadd.xlane.f32.xlu1 %v1409_v25  ;;  %v1406_v28 = vsel %vm755_vm10, %v2733_v24, 0.0 }
 0x95a   : > { %1407 = vadd.xlane.f32.xlu0 %v1406_v28 }
 0x96a   : > { %1076 = vrot.lane.b32.xlu1 %v3048_v39, %s2817_s18 }
 0x96e   : > { %1078 = vrot.lane.b32.xlu1 %v3046_v38, %s2817_s18 }
 0x970   : > { %2702 = vrot.lane.b32.xlu0 %v2968_v13, %s2818_s21  ;;  %s3109_s21 = scalar_lea.vmem %s3209_s7, %s2321_s29 }
 0x971   : > { %v1776_v56 = vld [vmem:[%s3109_s21] sm:$0xff]  ;;  %v1777_v59 = vld [vmem:[%s3109_s21 + $0x8] sm:$0xff]  ;;  %v1778_v63 = vld [vmem:[%s3109_s21 + $0x10] sm:$0xff] }
 0x972   : > { %1293 = vrot.lane.b32.xlu1 %v2439_v7, %s2819_s22  ;;  %v2580_v62 = vpack.c.bf16 %v1777_v59, %v1776_v56  ;;  %v1779_v0 = vld [vmem:[%s3109_s21 + $0x18] sm:$0xff]  ;;  %v2309_v55 = vld [vmem:[%s3109_s21 + $0x20] sm:$0xff]  ;;  %v2310_v58 = vld [vmem:[%s3109_s21 + $0x28] sm:$0xff] }
 0x973   : > { %v2583_v2 = vpack.c.bf16 %v1779_v0, %v1778_v63  ;;  %v2304_v59 = vld [vmem:[%s3104_s30 + $0x30] sm:$0xff]  ;;  %v2592_v61 = vpack.c.bf16 %v2310_v58, %v2309_v55  ;;  %v2312_v63 = vld [vmem:[%s3109_s21 + $0x38] sm:$0xff] }
 0x974   : > { %1291 = vrot.lane.b32.xlu0 %v1280_v8, %s2819_s22  ;;  %s2296_s22 = sshll.u32 %s2791_s14, 7  ;;  %v2589_v0 = vpack.c.bf16 %v2305_v60, %v2304_v59 }
 0x975   : > { %s1614_s23 = sadd.s32 1, %s2296_s22  ;;  %s1627_s24 = sadd.s32 2, %s2296_s22 }
 0x976   : > { %s1639_s25 = sadd.s32 3, %s2296_s22  ;;  %s1652_s29 = sadd.s32 4, %s2296_s22 }
 0x977   : > { %s1665_s27 = sadd.s32 5, %s2296_s22  ;;  %s1678_s11 = sadd.s32 6, %s2296_s22 }
 0x978   : > { %s1628_s12 = sld [smem:[#allocation3 + %s1627_s24]] }
 0x979   : > { %s3130_s18 = sld [smem:[#allocation3 + %s1639_s25]] }
 0x97a   : > { %s3132_s0 = sld [smem:[#allocation3 + %s1652_s29]] }
 0x97b   : > { %s1611_s1 = sld [smem:[#allocation3 + %s2296_s22]] }
 0x97c   : > { %s3134_s2 = sld [smem:[#allocation3 + %s1665_s27]] }
 0x97d   : > { %s3136_s14 = sld [smem:[#allocation3 + %s1678_s11]] }
 0x97e   : > { %v1629_v4 = vstv %s1628_s12 }
 0x97f   : > { %v1641_v5 = vstv %s3130_s18 }
 0x980   : > { %v1654_v6 = vstv %s3132_s0  ;;  %s3169_s0 = sshll.u32 %s2938_s28, 1 }
 0x981   : > { %v1612_v7 = vstv %s1611_s1  ;;  %s541_s3 = scalar_lea.vmem %s3210_s8, %s3169_s0 }
 0x982   : > { %v1667_v9 = vstv %s3134_s2 }
 0x983   : > { %v1680_v14 = vstv %s3136_s14 }
 0x9e6   : > { %v1411_v26 = vpop.xlane.xlu1 %1410 }
 0x9e7   : > { %2734 = vrcp.f32 %v1411_v26  ;;  %v1408_v29 = vpop.xlane.xlu0 %1407 }
 0x9e8   : > { %2736 = vrcp.f32 %v1408_v29 }
 0x9ea   : > { %v1077_v30 = vpop.permute.xlu1 %1076 }
 0x9eb   : > { %1083 = vst.msk [vmem:[#allocation2] sm:$0xff] %vm1082_vm15, %v1077_v30  ;;  %v2703_v31 = vpop.permute.xlu0 %2702 }
 0x9ec   : > { %v2705_v32 = vunpack.i.h.bf16 %v2703_v31  ;;  %v2704_v33 = vunpack.i.l.bf16 %v2703_v31 }
 0x9ee   : > { %v2559_v34 = vpack.c.bf16 %v2705_v32, %v2704_v33  ;;  %v1079_v35 = vpop.permute.xlu1 %1078 }
 0x9ef   : > { %1085 = vst.msk [vmem:[#allocation2 + $0x8] sm:$0x3f] %vm1084_vm1, %v1079_v35  ;;  %v1292_v13 = vpop.permute.xlu0 %1291 }
 0x9f0   : > { %1298 = vst.msk [vmem:[#allocation2] sm:$0xff] %vm1297_vm2, %v1292_v13  ;;  %2561 = vmatprep.subr.msk.bf16.mxu0 %vm3002_vm13, %v2559_v34 }
 0x9f1   : > { %v2735_v36 = vpop.eup %2734  ;;  %2564 = vmatpush3.bf16.msk.msra.mxu0 %vm3002_vm13, %v2559_v34 }
 0x9f2   : > { %v2737_v37 = vpop.eup %2736  ;;  %v1294_v38 = vpop.permute.xlu1 %1293  ;;  %v1415_v40 = vmul.f32 %v2735_v36, %v2731_v27  ;;  %2566 = vmatprep.subr.bf16.mxu0 %v2565_v43 }
 0x9f3   : > { %1300 = vst.msk [vmem:[#allocation2 + $0x8] sm:$0x3f] %vm1299_vm3, %v1294_v38  ;;  %v1414_v39 = vmul.f32 %v2737_v37, %v2733_v24 }
 0x9f5   : > { %2451 = vmatprep.mubr.msk.f32.mxu0 %vm755_vm10, %v1414_v39 }
 0x9f6   : > { %2452 = vmatmul.mubr.msk.f32.vlgmr.msra.gmra.mrb[6].mxu0 %vm755_vm10, %v1415_v40  ;;  %vm1672_vm10 = vcmask 1042432  }
 0x9f7   : > { %2568 = vmatpush3.bf16.msra.mxu0 %v2565_v43 }
 0x9f8   : > { %2570 = vmatprep.subr.bf16.mxu0 %v2569_v46 }
 0x9fb   : > { %2572 = vmatpush3.bf16.msra.mxu0 %v2569_v46 }
 0x9fc   : > { %2579 = vmatprep.subr.bf16.mxu0 %v2821_v53 }
 0xac9   : > { %v2453_v47 = vpop.f32.mrb[6].mxu0 }
 0xaca   : > { %1508 = vrot.lane.b32.xlu1 %v2453_v47, %s2820_s26  ;;  %v1495_v48 = vpop.f32.mrb[7].mxu0 }
 0xacb   : > { %1506 = vrot.lane.b32.xlu0 %v1495_v48, %s2820_s26  ;;  %s3128_s26 = sld [smem:[#allocation3 + %s1614_s23]] }
 0xad1   : > { %v1616_v10 = vstv %s3128_s26 }
 0xb3c   : > { %v1509_v49 = vpop.permute.xlu1 %1508 }
 0xb3d   : > { %1515 = vst.msk [vmem:[#allocation2 + $0x8] sm:$0x3f] %vm1514_vm4, %v1509_v49  ;;  %v1507_v50 = vpop.permute.xlu0 %1506 }
 0xb3e   : > { %1513 = vst.msk [vmem:[#allocation2] sm:$0xff] %vm1512_vm5, %v1507_v50 }
 0xb44   : > { %v1517_v52 = vld [vmem:[#allocation2 + $0x8] sm:$0x3f] }
 0xb45   : > { %v1516_v51 = vld [vmem:[#allocation2] sm:$0xff] }
 0xb46   : > { %2462 = vmatprep.mubr.msk.f32.mxu0 %vm563_vm0, %v1516_v51 }
 0xb47   : > { %2463 = vmatmul.mubr.msk.f32.vlgmr.msra.gmra.mrb[8].mxu0 %vm563_vm0, %v1517_v52  ;;  %v2302_v52 = vld [vmem:[%s3104_s30 + $0x20] sm:$0xff]  ;;  %s532_s30 = scalar_lea.vmem %s3208_s6, %s3169_s0 }
 0xb48   : > { %2484 = vmatprep.mubr.msk.f32.mxu0 %vm2822_vm6, %v2823_v57  ;;  %2581 = vmatpush3.bf16.msra.mxu0 %v2580_v62  ;;  %v2586_v56 = vpack.c.bf16 %v2303_v54, %v2302_v52  ;;  %v2311_v62 = vld [vmem:[%s3109_s21 + $0x30] sm:$0xff]  ;;  %s547_s21 = sadd.s32 %s3169_s0, %s3244_s13 }
 0xb49   : > { %2582 = vmatprep.subr.bf16.mxu0 %v2821_v53  ;;  %v2595_v1 = vpack.c.bf16 %v2312_v63, %v2311_v62  ;;  %s2261_s22 = sshll.u32 %s547_s21, 3 }
 0xb4a   : > { %s549_s26 = scalar_lea.vmem %s3212_s10, %s2261_s22 }
 0xb4c   : > { %2584 = vmatpush3.bf16.msra.mxu0 %v2583_v2 }
 0xb4d   : > { %2591 = vmatprep.subr.bf16.mxu0 %v2821_v53 }
 0xc1a   : > { %v2464_v3 = vpop.f32.mrb[8].mxu0 }
 0xc1b   : > { %v1607_v8 = vadd.f32 %v2464_v3, %v2293_v12  ;;  %v1601_v11 = vpop.f32.mrb[9].mxu0 }
 0xc1c   : > { %v1602_v15 = vadd.f32 %v2293_v12, %v1601_v11 }
 0xc1d   : > { %v1618_v16 = vmul.f32 %v1616_v10, %v1607_v8  ;;  %v1631_v18 = vmul.f32 %v1629_v4, %v1607_v8  ;;  %v1643_v17 = vmul.f32 %v1641_v5, %v1607_v8  ;;  %v1656_v19 = vmul.f32 %v1654_v6, %v1607_v8 }
 0xc1e   : > { %v1669_v20 = vmul.f32 %v1667_v9, %v1607_v8  ;;  %v1617_v21 = vmul.f32 %v1616_v10, %v1602_v15  ;;  %v1630_v22 = vmul.f32 %v1629_v4, %v1602_v15  ;;  %v1613_v23 = vmul.f32 %v1612_v7, %v1602_v15  ;;  %v2297_v7 = vld [vmem:[%s532_s30] ss:$0 sm:$0xff] }
 0xc1f   : > { %v1623_v27 = vrot.slane %v1618_v16, 1  ;;  %v1635_v24 = vrot.slane %v1631_v18, 2  ;;  %v1648_v25 = vrot.slane %v1643_v17, 3  ;;  %v1661_v28 = vrot.slane %v1656_v19, 4  ;;  %v2314_v17 = vld [vmem:[%s541_s3 + $0x1] ss:$0 sm:$0xff] }
 0xc20   : > { %v1674_v26 = vrot.slane %v1669_v20, 5  ;;  %v1622_v29 = vrot.slane %v1617_v21, 1  ;;  %v1634_v30 = vrot.slane %v1630_v22, 2  ;;  %v1642_v31 = vmul.f32 %v1641_v5, %v1602_v15 }
 0xc21   : > { %v1655_v32 = vmul.f32 %v1654_v6, %v1602_v15  ;;  %v1668_v33 = vmul.f32 %v1667_v9, %v1602_v15  ;;  %v1681_v34 = vmul.f32 %v1680_v14, %v1602_v15  ;;  %v1682_v35 = vmul.f32 %v1680_v14, %v1607_v8 }
 0xc22   : > { %v1624_v13 = vsel %vm1621_vm7, %v1622_v29, %v1623_v27  ;;  %v1636_v36 = vsel %vm790_vm11, %v1634_v30, %v1635_v24  ;;  %v1647_v37 = vrot.slane %v1642_v31, 3 }
 0xc23   : > { %v1626_v38 = vadd.f32 %v1624_v13, %v1613_v23  ;;  %v1660_v39 = vrot.slane %v1655_v32, 4  ;;  %v1673_v40 = vrot.slane %v1668_v33, 5  ;;  %v1686_v41 = vrot.slane %v1681_v34, 6 }
 0xc24   : > { %v1649_v42 = vsel %vm1646_vm8, %v1647_v37, %v1648_v25  ;;  %v1687_v43 = vrot.slane %v1682_v35, 6 }
 0xc25   : > { %v1638_v45 = vadd.f32 %v1636_v36, %v1626_v38  ;;  %v1662_v44 = vsel %vm1659_vm9, %v1660_v39, %v1661_v28  ;;  %v1675_v46 = vsel %vm1672_vm10, %v1673_v40, %v1674_v26  ;;  %v2307_v28 = vld [vmem:[%s532_s30 + $0x1] ss:$0 sm:$0xff] }
 0xc26   : > { %v1688_v47 = vsel %vm1685_vm12, %v1686_v41, %v1687_v43 }
 0xc27   : > { %v1651_v48 = vadd.f32 %v1649_v42, %v1638_v45 }
 0xc29   : > { %v1664_v49 = vadd.f32 %v1662_v44, %v1651_v48 }
 0xc2b   : > { %v1677_v50 = vadd.f32 %v1675_v46, %v1664_v49 }
 0xc2d   : > { %v1690_v51 = vadd.f32 %v1688_v47, %v1677_v50 }
 0xc2f   : > { %2474 = vmatmul.mubr.msk.f32.vlgmr.msra.gmra.mrb[10].mxu1 %vm563_vm0, %v1690_v51  ;;  %2485 = vmatmul.mubr.msk.f32.vlgmr.msra.gmra.mrb[10].mxu0 %vm563_vm0, %v1690_v51 }
 0xc30   : > { %2495 = vmatprep.mubr.msk.f32.mxu1 %vm2822_vm6, %v2823_v57  ;;  %2506 = vmatprep.mubr.msk.f32.mxu0 %vm2822_vm6, %v2823_v57  ;;  %v2299_v57 = vld [vmem:[%s541_s3] ss:$0 sm:$0xff] }
 0xc31   : > { %2587 = vmatpush3.bf16.msra.mxu1 %v2586_v56  ;;  %2593 = vmatpush3.bf16.msra.mxu0 %v2592_v61 }
 0xc32   : > { %2588 = vmatprep.subr.bf16.mxu1 %v2821_v53  ;;  %2594 = vmatprep.subr.bf16.mxu0 %v2821_v53 }
 0xc35   : > { %2590 = vmatpush3.bf16.msra.mxu1 %v2589_v0  ;;  %2596 = vmatpush3.bf16.msra.mxu0 %v2595_v1 }
 0xd02   : > { %v1771_v2 = vpop.f32.mrb[10].mxu1  ;;  %v1853_v12 = vpop.f32.mrb[10].mxu0 }
 0xd03   : > { %v1854_v10 = vadd.f32 %v2299_v57, %v1853_v12  ;;  %v2475_v3 = vpop.f32.mrb[11].mxu1  ;;  %v2486_v4 = vpop.f32.mrb[11].mxu0  ;;  %v1772_v8 = vadd.f32 %v2297_v7, %v1771_v2 }
 0xd05   : > { %v2301_v5 = vmul.f32 -1.442695, %v1854_v10  ;;  %v1775_v11 = vmax.f32 %v1772_v8, 0.0 }
 0xd07   : > { %2738 = vpow2.f32 %v2301_v5 }
 0xd11   : > { %v2739_v6 = vpop.eup %2738 }
 0xd12   : > { %v1860_v53 = vadd.f32 1.0, %v2739_v6 }
 0xd14   : > { %2740 = vrcp.f32 %v1860_v53 }
 0xd1e   : > { %v2741_v9 = vpop.eup %2740 }
 0xd1f   : > { %v1864_v14 = vsub.f32 1.0, %v2741_v9  ;;  %v1863_v15 = vmul.f32 %v2741_v9, %v1690_v51 }
 0xd21   : > { %v1865_v16 = vmul.f32 %v1864_v14, %v1775_v11 }
 0xd23   : > { %v1866_v18 = vadd.f32 %v1865_v16, %v1863_v15 }
 0xd25   : > { %2496 = vmatmul.mubr.msk.f32.vlgmr.msra.gmra.mrb[12].mxu1 %vm563_vm0, %v1866_v18  ;;  %2507 = vmatmul.mubr.msk.f32.vlgmr.msra.gmra.mrb[12].mxu0 %vm563_vm0, %v1866_v18 }
 0xdf8   : > { %v1949_v19 = vpop.f32.mrb[12].mxu1  ;;  %v2033_v20 = vpop.f32.mrb[12].mxu0 }
 0xdf9   : > { %v2034_v21 = vadd.f32 %v2314_v17, %v2033_v20  ;;  %v2497_v22 = vpop.f32.mrb[13].mxu1  ;;  %v2508_v23 = vpop.f32.mrb[13].mxu0  ;;  %v1950_v26 = vadd.f32 %v2307_v28, %v1949_v19 }
 0xdfb   : > { %v2316_v27 = vmul.f32 -1.442695, %v2034_v21  ;;  %v1953_v30 = vmax.f32 %v1950_v26, 0.0 }
 0xdfd   : > { %2742 = vpow2.f32 %v2316_v27 }
 0xe07   : > { %v2743_v24 = vpop.eup %2742 }
 0xe08   : > { %v2040_v25 = vadd.f32 1.0, %v2743_v24 }
 0xe0a   : > { %2744 = vrcp.f32 %v2040_v25 }
 0xe14   : > { %v2745_v29 = vpop.eup %2744 }
 0xe15   : > { %v2044_v31 = vsub.f32 1.0, %v2745_v29  ;;  %v2043_v32 = vmul.f32 %v2745_v29, %v1866_v18 }
 0xe17   : > { %v2045_v33 = vmul.f32 %v2044_v31, %v1953_v30 }
 0xe19   : > { %v2046_v34 = vadd.f32 %v2045_v33, %v2043_v32 }
 0xe1b   : > { %2047 = vst.msk [vmem:[%s549_s26] sm:$0xff] %vm563_vm0, %v2046_v34 }
 0xe1c PF: > { %s21_s17 = sadd.s32 1, %s2803_s17   ;;  %s3233_s13 = smov %s2795_s15 }
 0xe1d   : > { %p18_p5 = scmp.ge.s32.totalorder %s21_s17, 6   ;;  %s3234_s14 = smov %s2799_s16 }
 0xe1e   : > { %s3235_s15 = smov %s3238_s19  ;;  %s3236_s16 = smov %s3242_s20 }
 0xe1f   :  { %20 = sbr.rel (!%p18_p5) target bundleno = 9 (0x9), region = 123 }
 0xe26   :  { %2075 = vsyncpa [#allocation4], 1 }
 0xe27   :  { %2077 = vsyncpa [#allocation4 + $0x1], 1 }

</bundles_post_ra>
